<compile_context>
chip_gen: v7x
topology: tpu7x:2x2x1
jax: 0.10.0
libtpu: 0.0.40
codegen_flags: <defaults>
</compile_context>

<pallas_src>
import jax
import jax.numpy as jnp
from jax.experimental import pallas as pl
from jax.experimental.pallas import tpu as pltpu

IN_FEATURES = 1200
K_PAD = 1280          # 1200 rounded up to a multiple of 128
HIDDEN = 512
LATENT_DIMS = 32
L_PAD = 128           # lane-dense output width (keep at 128; 2nd matmul is <10% FLOPs)
TILE_B_MAX = 1024     # large tiles amortize ~0.35us per-grid-step overhead


def _cdiv(a, m):
    return (a + m - 1) // m


def _round_up(x, m):
    return ((x + m - 1) // m) * m


def _choose_tile_b(B):
    """Balanced batch tile: multiple of 16 (bf16 sublane packing), <= TILE_B_MAX,
    and >= 2 grid steps once the batch is big enough to feed both v7x TensorCores."""
    n_tiles = max(_cdiv(B, TILE_B_MAX), 1)
    if n_tiles < 2 and B >= 32:        # keep both v7x TCs busy at moderate batch
        n_tiles = 2
    return min(_round_up(_cdiv(B, n_tiles), 16), TILE_B_MAX)


def encoder_kernel(x_ref, w1_ref, b1_ref, w2_ref, b2_ref, o_ref):
    # x_ref:  (TB, 1280) bf16    w1_ref: (1280, 512) bf16   b1_ref: (1, 512) f32
    # w2_ref: (512, 128) bf16    b2_ref: (1, 128) f32       o_ref:  (TB, 128) f32
    h = jnp.dot(x_ref[...], w1_ref[...], preferred_element_type=jnp.float32)
    h = jnp.maximum(h + b1_ref[...], 0.0)                       # bias + ReLU in f32
    y = jnp.dot(h.astype(jnp.bfloat16), w2_ref[...],
                preferred_element_type=jnp.float32)
    o_ref[...] = (y + b2_ref[...]).astype(o_ref.dtype)


def encoder_forward(x_nchw, w1, b1, w2, b2):
    """x_nchw: (B, C, H, W) with C*H*W == 1200.
    w1: (1200, 512), b1: (1, 512), w2: (512, L), b2: (1, L).  Returns (B, L) f32."""
    B = x_nchw.shape[0]
    L = w2.shape[1]

    # ---- weight/bias preparation (bf16 weights, padded to aligned shapes) ----
    w1p = jnp.zeros((K_PAD, HIDDEN), jnp.bfloat16).at[:IN_FEATURES, :].set(
        w1.astype(jnp.bfloat16))
    w2p = jnp.zeros((HIDDEN, L_PAD), jnp.bfloat16).at[:, :L].set(
        w2.astype(jnp.bfloat16))
    b1p = b1.reshape(1, HIDDEN).astype(jnp.float32)
    b2p = jnp.zeros((1, L_PAD), jnp.float32).at[0, :L].set(
        b2.reshape(-1).astype(jnp.float32))

    # ---- input: flatten + bf16 cast + explicit zero pad (K 1200->1280, batch) ----
    x = x_nchw.reshape(B, -1).astype(jnp.bfloat16)   # == torch.flatten(x, start_dim=1)
    assert x.shape[1] == IN_FEATURES
    tile_b = _choose_tile_b(B)
    b_pad = _round_up(B, tile_b)
    num_tiles = b_pad // tile_b
    xp = jnp.pad(x, ((0, b_pad - B), (0, K_PAD - IN_FEATURES)))   # zeros, bf16

    flops = 2 * b_pad * (K_PAD * HIDDEN + HIDDEN * L_PAD)
    bytes_accessed = (xp.size * 2 + w1p.size * 2 + w2p.size * 2
                      + b1p.size * 4 + b2p.size * 4 + b_pad * L_PAD * 4)

    resident = dict(pipeline_mode=pl.Buffered(1))   # constant-index blocks: 1 buffer

    out = pl.pallas_call(
        encoder_kernel,
        out_shape=jax.ShapeDtypeStruct((b_pad, L_PAD), jnp.float32),
        grid=(num_tiles,),
        in_specs=[
            pl.BlockSpec((tile_b, K_PAD), lambda i: (i, 0)),             # x (tiled)
            pl.BlockSpec((K_PAD, HIDDEN), lambda i: (0, 0), **resident), # W1 resident
            pl.BlockSpec((1, HIDDEN), lambda i: (0, 0), **resident),     # b1 resident
            pl.BlockSpec((HIDDEN, L_PAD), lambda i: (0, 0), **resident), # W2 resident
            pl.BlockSpec((1, L_PAD), lambda i: (0, 0), **resident),      # b2 resident
        ],
        out_specs=pl.BlockSpec((tile_b, L_PAD), lambda i: (i, 0)),
        compiler_params=pltpu.CompilerParams(
            dimension_semantics=("parallel",),   # batch tiles shard across v7x's 2 TCs
            vmem_limit_bytes=32 << 20,           # ~10 MiB working set at tile_b=1024
        ),
        cost_estimate=pl.CostEstimate(
            flops=flops, transcendentals=0, bytes_accessed=bytes_accessed),
    )(xp, w1p, b1p, w2p, b2p)

    return out[:B, :L]   # strip batch + lane padding


def init_params(key, latent_dims=LATENT_DIMS):
    """Deterministic init mimicking nn.Linear default (uniform +/- 1/sqrt(fan_in)).
    Weights stored transposed: (in_features, out_features)."""
    k1, k2, k3, k4 = jax.random.split(key, 4)
    bound1 = 1.0 / jnp.sqrt(IN_FEATURES)
    bound2 = 1.0 / jnp.sqrt(HIDDEN)
    w1 = jax.random.uniform(k1, (IN_FEATURES, HIDDEN), jnp.float32, -bound1, bound1)
    b1 = jax.random.uniform(k2, (1, HIDDEN), jnp.float32, -bound1, bound1)
    w2 = jax.random.uniform(k3, (HIDDEN, latent_dims), jnp.float32, -bound2, bound2)
    b2 = jax.random.uniform(k4, (1, latent_dims), jnp.float32, -bound2, bound2)
    return w1, b1, w2, b2


if __name__ == "__main__":
    key = jax.random.PRNGKey(0)
    kx, kp = jax.random.split(key)

    # (B, C, H, W) = (2, 3, 20, 20): 3*20*20 = 1200 features after flatten.
    x = jax.random.normal(kx, (2, 3, 20, 20), jnp.float32)
    w1, b1, w2, b2 = init_params(kp, LATENT_DIMS)

    out = encoder_forward(x, w1, b1, w2, b2)
    out = jax.block_until_ready(out)

    # Pure-JAX reference using the same bf16 inputs / weights with f32 accumulation
    # (exactly what the kernel's MXU matmuls compute), so tolerances stay tight.
    xf = x.reshape(x.shape[0], -1).astype(jnp.bfloat16)
    w1b = w1.astype(jnp.bfloat16)
    w2b = w2.astype(jnp.bfloat16)
    h = jnp.maximum(
        jnp.dot(xf, w1b, preferred_element_type=jnp.float32) + b1, 0.0)
    ref = jnp.dot(h.astype(jnp.bfloat16), w2b,
                  preferred_element_type=jnp.float32) + b2

    assert out.shape == (2, LATENT_DIMS)
    assert jnp.allclose(out, ref, atol=1e-3, rtol=1e-3)

    print("KERNEL_OK")
</pallas_src>

<mosaic_0001>
module attributes {stable_mosaic.version = 11 : i64} {
  func.func @encoder_kernel(%arg0: i32, %arg1: memref<16x1280xbf16, #tpu.memory_space<vmem>>, %arg2: memref<1280x512xbf16, #tpu.memory_space<vmem>>, %arg3: memref<1x512xf32, #tpu.memory_space<vmem>>, %arg4: memref<512x128xbf16, #tpu.memory_space<vmem>>, %arg5: memref<1x128xf32, #tpu.memory_space<vmem>>, %arg6: memref<16x128xf32, #tpu.memory_space<vmem>>) attributes {dimension_semantics = [#tpu.dimension_semantics<parallel>], iteration_bounds = array<i64: 1>, scalar_prefetch = 0 : i64, scratch_operands = 0 : i64, tpu.core_type = #tpu.core_type<tc>, window_params = [{transform_indices = @transform_0, window_bounds = array<i64: 16, 1280>}, {pipeline_mode = #tpu.pipeline_mode<synchronous>, transform_indices = @transform_1, window_bounds = array<i64: 1280, 512>}, {pipeline_mode = #tpu.pipeline_mode<synchronous>, transform_indices = @transform_2, window_bounds = array<i64: 1, 512>}, {pipeline_mode = #tpu.pipeline_mode<synchronous>, transform_indices = @transform_3, window_bounds = array<i64: 512, 128>}, {pipeline_mode = #tpu.pipeline_mode<synchronous>, transform_indices = @transform_4, window_bounds = array<i64: 1, 128>}, {transform_indices = @transform_5, window_bounds = array<i64: 16, 128>}]} {
    %c0 = arith.constant 0 : index
    %c0_0 = arith.constant 0 : index
    %0 = vector.load %arg1[%c0, %c0_0] : memref<16x1280xbf16, #tpu.memory_space<vmem>>, vector<16x1280xbf16>
    %c0_1 = arith.constant 0 : index
    %c0_2 = arith.constant 0 : index
    %1 = vector.load %arg2[%c0_1, %c0_2] : memref<1280x512xbf16, #tpu.memory_space<vmem>>, vector<1280x512xbf16>
    %cst = arith.constant dense<0.000000e+00> : vector<16x512xf32>
    %2 = tpu.matmul %0, %1, %cst {dimension_numbers = #tpu.dot_dimension_numbers<[1], [0], [0], [1], [0, 0, 1, 1], [], []>} : vector<16x1280xbf16>, vector<1280x512xbf16>, vector<16x512xf32> -> vector<16x512xf32>
    %c0_3 = arith.constant 0 : index
    %c0_4 = arith.constant 0 : index
    %3 = vector.load %arg3[%c0_3, %c0_4] : memref<1x512xf32, #tpu.memory_space<vmem>>, vector<1x512xf32>
    %4 = vector.broadcast %3 : vector<1x512xf32> to vector<16x512xf32>
    %5 = arith.addf %2, %4 : vector<16x512xf32>
    %cst_5 = arith.constant 0.000000e+00 : f32
    %6 = vector.broadcast %cst_5 : f32 to vector<16x512xf32>
    %7 = arith.maximumf %5, %6 : vector<16x512xf32>
    %8 = arith.truncf %7 : vector<16x512xf32> to vector<16x512xbf16>
    %c0_6 = arith.constant 0 : index
    %c0_7 = arith.constant 0 : index
    %9 = vector.load %arg4[%c0_6, %c0_7] : memref<512x128xbf16, #tpu.memory_space<vmem>>, vector<512x128xbf16>
    %cst_8 = arith.constant dense<0.000000e+00> : vector<16x128xf32>
    %10 = tpu.matmul %8, %9, %cst_8 {dimension_numbers = #tpu.dot_dimension_numbers<[1], [0], [0], [1], [0, 0, 1, 1], [], []>} : vector<16x512xbf16>, vector<512x128xbf16>, vector<16x128xf32> -> vector<16x128xf32>
    %c0_9 = arith.constant 0 : index
    %c0_10 = arith.constant 0 : index
    %11 = vector.load %arg5[%c0_9, %c0_10] : memref<1x128xf32, #tpu.memory_space<vmem>>, vector<1x128xf32>
    %12 = vector.broadcast %11 : vector<1x128xf32> to vector<16x128xf32>
    %13 = arith.addf %10, %12 : vector<16x128xf32>
    %c0_11 = arith.constant 0 : index
    %c0_12 = arith.constant 0 : index
    %14 = vector.load %arg6[%c0_11, %c0_12] : memref<16x128xf32, #tpu.memory_space<vmem>>, vector<16x128xf32>
    tpu.vector_store %arg6[%c0_11, %c0_12], %13 {strides = array<i32>} : memref<16x128xf32, #tpu.memory_space<vmem>>, vector<16x128xf32>,
    return
  }
  func.func @transform_0(%arg0: i32) -> (i32, i32) {
    %c0_i32 = arith.constant 0 : i32
    %c0_i32_0 = arith.constant 0 : i32
    return %arg0, %c0_i32 : i32, i32
  }
  func.func @transform_1(%arg0: i32) -> (i32, i32) {
    %c0_i32 = arith.constant 0 : i32
    %c0_i32_0 = arith.constant 0 : i32
    %c0_i32_1 = arith.constant 0 : i32
    return %c0_i32, %c0_i32_0 : i32, i32
  }
  func.func @transform_2(%arg0: i32) -> (i32, i32) {
    %c0_i32 = arith.constant 0 : i32
    %c0_i32_0 = arith.constant 0 : i32
    %c0_i32_1 = arith.constant 0 : i32
    return %c0_i32, %c0_i32_0 : i32, i32
  }
  func.func @transform_3(%arg0: i32) -> (i32, i32) {
    %c0_i32 = arith.constant 0 : i32
    %c0_i32_0 = arith.constant 0 : i32
    %c0_i32_1 = arith.constant 0 : i32
    return %c0_i32, %c0_i32_0 : i32, i32
  }
  func.func @transform_4(%arg0: i32) -> (i32, i32) {
    %c0_i32 = arith.constant 0 : i32
    %c0_i32_0 = arith.constant 0 : i32
    %c0_i32_1 = arith.constant 0 : i32
    return %c0_i32, %c0_i32_0 : i32, i32
  }
  func.func @transform_5(%arg0: i32) -> (i32, i32) {
    %c0_i32 = arith.constant 0 : i32
    %c0_i32_0 = arith.constant 0 : i32
    return %arg0, %c0_i32 : i32, i32
  }
}

</mosaic_0001>

<bundles_post_ra>
// kernel: tpu_custom_call.1
= control target key start
LH: loop header
LB: loop body
LE: loop exit
PB: predicated region body
PF: predicated region fallthrough
CT: control target
= control target key end

     0   :  { %10 = vsyncpa [#allocation3], 0  ;;  %s4140_s0 = inlined_call_operand.hbm [shape: bf16[16,1280], index: 0, kind: input, shape index: {}]   ;;  %s4141_s1 = inlined_call_operand.hbm [shape: bf16[1280,512], index: 1, kind: input, shape index: {}]   ;;  %s4142_s2 = inlined_call_operand.hbm [shape: f32[1,512], index: 2, kind: input, shape index: {}]   ;;  %s4143_s3 = inlined_call_operand.hbm [shape: bf16[512,128], index: 3, kind: input, shape index: {}]   ;;  %s4144_s4 = inlined_call_operand.hbm [shape: f32[1,128], index: 4, kind: input, shape index: {}]   ;;  %s4145_s5 = inlined_call_operand.hbm [shape: f32[16,128], index: 5, kind: output, shape index: {}]  }
   0x1   :  { %11 = vsyncpa [#allocation6], 0 }
   0x2   :  { %12 = vsyncpa [#allocation9], 0 }
   0x3   :  { %13 = vsyncpa [#allocation4], 0  ;;  %s4024_s18 = smov [#allocation5]   ;;  %s3884_s22 = scalar_lea.hbm %s4141_s1, 40960 }
   0x4   :  { %s31_s19 = sshll.u32 %s4024_s18, 4  ;;  %p3885_p0 = scmp.ne.s32.totalorder %s4141_s1, %s3884_s22  ;;  %s32_s19 = int_to_ptr.vmem [resolvable:$true] %s31_s19 }
   0x5   :  { %p3888_p1 = scmp.lt.u32.totalorder %s3884_s22, %s4141_s1 }
   0x7   :  { %p3890_p2 = pnand %p3888_p1, %p3885_p0 }
   0x9   :  { %3893 = shalt.err (!%p3890_p2)
}
   0xa   :  { %s3894_s27 = scalar_lea.vmem %s32_s19, 40960  ;;  %p3899_p4 = scmp.lt.s32.totalorder %s32_s19, %s32_s19 }
   0xb   :  { %p3895_p3 = scmp.ne.s32.totalorder %s32_s19, %s3894_s27  ;;  %p3900_p5 = scmp.lt.s32.totalorder %s3894_s27, %s3894_s27 }
   0xd   :  { %p3901_p6 = por %p3900_p5, %p3899_p4 }
   0xf   :  { %p3902_p7 = pnand %p3901_p6, %p3895_p3 }
  0x11   :  { %3905 = shalt.err (!%p3902_p7)
}
  0x12   :  { %s4025_s28 = smov 256   ;;  %s4026_s29 = smov 16  }
  0x13   :  { %37 = dma.hbm_to_vmem [thread:$0]  %s4141_s1, 40960, %s32_s19, [#allocation6], %s4025_s28, %s4025_s28, %s4026_s29  }
  0x14   :  { %s4027_s7 = smov [#allocation8]   ;;  %s3906_s11 = scalar_lea.hbm %s4143_s3, 4096 }
  0x15   :  { %s53_s8 = sshll.u32 %s4027_s7, 4  ;;  %p3907_p8 = scmp.ne.s32.totalorder %s4143_s3, %s3906_s11  ;;  %s54_s8 = int_to_ptr.vmem [resolvable:$true] %s53_s8 }
  0x16   :  { %p3910_p9 = scmp.lt.u32.totalorder %s3906_s11, %s4143_s3 }
  0x18   :  { %p3912_p10 = pnand %p3910_p9, %p3907_p8 }
  0x1a   :  { %3915 = shalt.err (!%p3912_p10)
}
  0x1b   :  { %s3916_s16 = scalar_lea.vmem %s54_s8, 4096  ;;  %p3921_p12 = scmp.lt.s32.totalorder %s54_s8, %s54_s8 }
  0x1c   :  { %p3917_p11 = scmp.ne.s32.totalorder %s54_s8, %s3916_s16  ;;  %p3922_p13 = scmp.lt.s32.totalorder %s3916_s16, %s3916_s16 }
  0x1e   :  { %p3923_p0 = por %p3922_p13, %p3921_p12 }
  0x20   :  { %p3924_p1 = pnand %p3923_p0, %p3917_p11 }
  0x22   :  { %3927 = shalt.err (!%p3924_p1)
}
  0x23   :  { %s4028_s1 = smov 64   ;;  %s4029_s17 = smov 4  }
  0x24   :  { %59 = dma.hbm_to_vmem [thread:$0]  %s4143_s3, 4096, %s54_s8, [#allocation9], %s4028_s1, %s4028_s1, %s4029_s17  }
  0x25   :  { %s4030_s20 = smov [#allocation2]   ;;  %s3928_s24 = scalar_lea.hbm %s4140_s0, 1280 }
  0x26   :  { %s19_s21 = sshll.u32 %s4030_s20, 4  ;;  %p3929_p2 = scmp.ne.s32.totalorder %s4140_s0, %s3928_s24  ;;  %s20_s21 = int_to_ptr.vmem [resolvable:$true] %s19_s21 }
  0x27   :  { %p3932_p3 = scmp.lt.u32.totalorder %s3928_s24, %s4140_s0 }
  0x29   :  { %p3934_p4 = pnand %p3932_p3, %p3929_p2 }
  0x2b   :  { %3937 = shalt.err (!%p3934_p4)
}
  0x2c   :  { %s3938_s29 = scalar_lea.vmem %s20_s21, 1280  ;;  %p3943_p6 = scmp.lt.s32.totalorder %s20_s21, %s20_s21 }
  0x2d   :  { %p3939_p5 = scmp.ne.s32.totalorder %s20_s21, %s3938_s29  ;;  %p3944_p7 = scmp.lt.s32.totalorder %s3938_s29, %s3938_s29 }
  0x2f   :  { %p3945_p8 = por %p3944_p7, %p3943_p6 }
  0x31   :  { %p3946_p9 = pnand %p3945_p8, %p3939_p5 }
  0x33   :  { %3949 = shalt.err (!%p3946_p9)
}
  0x34   :  { %s4031_s3 = smov 640   ;;  %s4032_s30 = smov 40  }
  0x35   :  { %25 = dma.hbm_to_vmem [thread:$0]  %s4140_s0, 1280, %s20_s21, [#allocation3], %s4031_s3, %s4031_s3, %s4032_s30  }
  0x36   :  { %s4033_s8 = smov [#allocation7]   ;;  %s4034_s10 = smov [#allocation10]  }
  0x37   :  { %s44_s9 = sshll.u32 %s4033_s8, 4  ;;  %s66_s11 = sshll.u32 %s4034_s10, 4  ;;  %s45_s9 = int_to_ptr.vmem [resolvable:$true] %s44_s9  ;;  %s67_s11 = int_to_ptr.vmem [resolvable:$true] %s66_s11 }
  0x38   :  { %s3950_s14 = scalar_lea.hbm %s4142_s2, 64 }
  0x39   :  { %p3951_p10 = scmp.ne.s32.totalorder %s4142_s2, %s3950_s14  ;;  %p3954_p11 = scmp.lt.u32.totalorder %s3950_s14, %s4142_s2 }
  0x3b   :  { %p3956_p12 = pnand %p3954_p11, %p3951_p10 }
  0x3d   :  { %3959 = shalt.err (!%p3956_p12)
}
  0x3e   :  { %s3960_s0 = scalar_lea.vmem %s45_s9, 64  ;;  %p3965_p0 = scmp.lt.s32.totalorder %s45_s9, %s45_s9 }
  0x3f   :  { %p3961_p13 = scmp.ne.s32.totalorder %s45_s9, %s3960_s0  ;;  %p3966_p1 = scmp.lt.s32.totalorder %s3960_s0, %s3960_s0 }
  0x41   :  { %p3967_p2 = por %p3966_p1, %p3965_p0 }
  0x43   :  { %p3968_p3 = pnand %p3967_p2, %p3961_p13 }
  0x45   :  { %3971 = shalt.err (!%p3968_p3)
}
  0x46   :  { %47 = dma.hbm_to_vmem [thread:$0]  %s4142_s2, 64, %s45_s9, [#allocation6]  }
  0x47   :  { %s3972_s22 = scalar_lea.hbm %s4144_s4, 16 }
  0x48   :  { %p3973_p4 = scmp.ne.s32.totalorder %s4144_s4, %s3972_s22  ;;  %p3976_p5 = scmp.lt.u32.totalorder %s3972_s22, %s4144_s4 }
  0x4a   :  { %p3978_p6 = pnand %p3976_p5, %p3973_p4 }
  0x4c   :  { %3981 = shalt.err (!%p3978_p6)
}
  0x4d   :  { %s3982_s27 = scalar_lea.vmem %s67_s11, 16  ;;  %s3986_s28 = scalar_lea.vmem %s67_s11, 32 }
  0x4e   :  { %p3983_p7 = scmp.ne.s32.totalorder %s67_s11, %s3982_s27  ;;  %p3987_p8 = scmp.lt.s32.totalorder %s67_s11, %s67_s11 }
  0x4f   :  { %p3988_p9 = scmp.lt.s32.totalorder %s3986_s28, %s3982_s27 }
  0x51   :  { %p3989_p10 = por %p3988_p9, %p3987_p8 }
  0x53   :  { %p3990_p11 = pnand %p3989_p10, %p3983_p7 }
  0x55   :  { %3993 = shalt.err (!%p3990_p11)
}
  0x56   :  { %69 = dma.hbm_to_vmem [thread:$0]  %s4144_s4, 16, %s67_s11, [#allocation9]  }
  0x57   :  { %4016 = dma.done.wait [#allocation3], 1280  }
  0x58   :  { %4017 = vsyncadd [#allocation3], 4294966016 }
  0x59   :  { %4018 = dma.done.wait [#allocation6], 41024  }
  0x5a   :  { %4019 = vsyncadd [#allocation6], 4294926272 }
  0x5b   :  { %4020 = dma.done.wait [#allocation9], 4112  }
  0x5c   :  { %4021 = vsyncadd [#allocation9], 4294963184  ;;  %v3357_v0 = vld [vmem:[#allocation5 + $0x4] ss:$16 sps:$4 sm:$0xff]   ;;  %v3359_v1 = vld [vmem:[#allocation5 + $0xc] ss:$16 sps:$4 sm:$0xff]  }
  0x5d   :  { %2088 = vmatprep.subr.bf16.mxu0 %v3357_v0  ;;  %v3361_v2 = vld [vmem:[#allocation5] ss:$16 sps:$4 sm:$0xff]   ;;  %v3362_v3 = vld [vmem:[#allocation5 + $0x8] ss:$16 sps:$4 sm:$0xff]   ;;  %2303 = vmatprep.subr.bf16.mxu1 %v3359_v1  ;;  %v3363_v4 = vld [vmem:[#allocation5 + $0x24] ss:$16 sps:$4 sm:$0xff]  }
  0x5e   :  { %2089 = vmatpush1.bf16.msra.mxu0 %v3361_v2  ;;  %2304 = vmatpush1.bf16.msra.mxu1 %v3362_v3  ;;  %v3365_v5 = vld [vmem:[#allocation5 + $0x2c] ss:$16 sps:$4 sm:$0xff]   ;;  %v3367_v6 = vld [vmem:[#allocation5 + $0x20] ss:$16 sps:$4 sm:$0xff]   ;;  %v3368_v7 = vld [vmem:[#allocation5 + $0x28] ss:$16 sps:$4 sm:$0xff]  }
  0x5f   :  { %2090 = vmatprep.subr.bf16.mxu0 %v3363_v4  ;;  %2305 = vmatprep.subr.bf16.mxu1 %v3365_v5  ;;  %v3369_v8 = vld [vmem:[#allocation5 + $0x44] ss:$16 sps:$4 sm:$0xff]   ;;  %v3371_v9 = vld [vmem:[#allocation5 + $0x4c] ss:$16 sps:$4 sm:$0xff]   ;;  %v3373_v10 = vld [vmem:[#allocation5 + $0x40] ss:$16 sps:$4 sm:$0xff]  }
  0x60   :  { %v3374_v11 = vld [vmem:[#allocation5 + $0x48] ss:$16 sps:$4 sm:$0xff]   ;;  %v3375_v12 = vld [vmem:[#allocation5 + $0x64] ss:$16 sps:$4 sm:$0xff]   ;;  %v3377_v13 = vld [vmem:[#allocation5 + $0x6c] ss:$16 sps:$4 sm:$0xff]  }
  0x61   :  { %v3379_v14 = vld [vmem:[#allocation5 + $0x60] ss:$16 sps:$4 sm:$0xff]   ;;  %v3380_v15 = vld [vmem:[#allocation5 + $0x68] ss:$16 sps:$4 sm:$0xff]   ;;  %v3381_v16 = vld [vmem:[#allocation5 + $0x84] ss:$16 sps:$4 sm:$0xff]  }
  0x62   :  { %2091 = vmatpush1.bf16.msra.mxu0 %v3367_v6  ;;  %2306 = vmatpush1.bf16.msra.mxu1 %v3368_v7  ;;  %v3383_v17 = vld [vmem:[#allocation5 + $0x8c] ss:$16 sps:$4 sm:$0xff]   ;;  %v3385_v18 = vld [vmem:[#allocation5 + $0x80] ss:$16 sps:$4 sm:$0xff]   ;;  %v3386_v19 = vld [vmem:[#allocation5 + $0x88] ss:$16 sps:$4 sm:$0xff]  }
  0x63   :  { %2092 = vmatprep.subr.bf16.mxu0 %v3369_v8  ;;  %2307 = vmatprep.subr.bf16.mxu1 %v3371_v9  ;;  %v3387_v20 = vld [vmem:[#allocation5 + $0xa4] ss:$16 sps:$4 sm:$0xff]   ;;  %v3389_v21 = vld [vmem:[#allocation5 + $0xac] ss:$16 sps:$4 sm:$0xff]   ;;  %v3391_v22 = vld [vmem:[#allocation5 + $0xa0] ss:$16 sps:$4 sm:$0xff]  }
  0x64   :  { %v3392_v23 = vld [vmem:[#allocation5 + $0xa8] ss:$16 sps:$4 sm:$0xff]   ;;  %v3393_v24 = vld [vmem:[#allocation5 + $0xc4] ss:$16 sps:$4 sm:$0xff]   ;;  %v3395_v25 = vld [vmem:[#allocation5 + $0xcc] ss:$16 sps:$4 sm:$0xff]  }
  0x65   :  { %v3397_v26 = vld [vmem:[#allocation5 + $0xc0] ss:$16 sps:$4 sm:$0xff]   ;;  %v3398_v27 = vld [vmem:[#allocation5 + $0xc8] ss:$16 sps:$4 sm:$0xff]   ;;  %v3399_v28 = vld [vmem:[#allocation5 + $0xe4] ss:$16 sps:$4 sm:$0xff]  }
  0x66   :  { %2093 = vmatpush1.bf16.msra.mxu0 %v3373_v10  ;;  %2308 = vmatpush1.bf16.msra.mxu1 %v3374_v11  ;;  %v3401_v29 = vld [vmem:[#allocation5 + $0xec] ss:$16 sps:$4 sm:$0xff]   ;;  %v3403_v30 = vld [vmem:[#allocation5 + $0xe0] ss:$16 sps:$4 sm:$0xff]   ;;  %v3404_v31 = vld [vmem:[#allocation5 + $0xe8] ss:$16 sps:$4 sm:$0xff]  }
  0x67   :  { %2094 = vmatprep.subr.bf16.mxu0 %v3375_v12  ;;  %2309 = vmatprep.subr.bf16.mxu1 %v3377_v13  ;;  %v3405_v32 = vld [vmem:[#allocation5 + $0x104] ss:$16 sps:$4 sm:$0xff]   ;;  %v3407_v33 = vld [vmem:[#allocation5 + $0x10c] ss:$16 sps:$4 sm:$0xff]   ;;  %v3409_v34 = vld [vmem:[#allocation5 + $0x100] ss:$16 sps:$4 sm:$0xff]  }
  0x68   :  { %v3410_v35 = vld [vmem:[#allocation5 + $0x108] ss:$16 sps:$4 sm:$0xff]   ;;  %v3411_v36 = vld [vmem:[#allocation5 + $0x124] ss:$16 sps:$4 sm:$0xff]   ;;  %v3413_v37 = vld [vmem:[#allocation5 + $0x12c] ss:$16 sps:$4 sm:$0xff]  }
  0x69   :  { %v3415_v38 = vld [vmem:[#allocation5 + $0x120] ss:$16 sps:$4 sm:$0xff]   ;;  %v3416_v39 = vld [vmem:[#allocation5 + $0x128] ss:$16 sps:$4 sm:$0xff]   ;;  %v3417_v40 = vld [vmem:[#allocation5 + $0x144] ss:$16 sps:$4 sm:$0xff]  }
  0x6a   :  { %2095 = vmatpush1.bf16.msra.mxu0 %v3379_v14  ;;  %2310 = vmatpush1.bf16.msra.mxu1 %v3380_v15  ;;  %v3419_v41 = vld [vmem:[#allocation5 + $0x14c] ss:$16 sps:$4 sm:$0xff]   ;;  %v3421_v42 = vld [vmem:[#allocation5 + $0x140] ss:$16 sps:$4 sm:$0xff]   ;;  %v3422_v43 = vld [vmem:[#allocation5 + $0x148] ss:$16 sps:$4 sm:$0xff]  }
  0x6b   :  { %2096 = vmatprep.subr.bf16.mxu0 %v3381_v16  ;;  %2311 = vmatprep.subr.bf16.mxu1 %v3383_v17  ;;  %v3423_v44 = vld [vmem:[#allocation5 + $0x164] ss:$16 sps:$4 sm:$0xff]   ;;  %v3425_v45 = vld [vmem:[#allocation5 + $0x16c] ss:$16 sps:$4 sm:$0xff]   ;;  %v3427_v46 = vld [vmem:[#allocation5 + $0x160] ss:$16 sps:$4 sm:$0xff]  }
  0x6c   :  { %v3428_v47 = vld [vmem:[#allocation5 + $0x168] ss:$16 sps:$4 sm:$0xff]   ;;  %v3455_v48 = vld [vmem:[#allocation2 + $0x4] ss:$40 sps:$4 sm:$0xff]   ;;  %v3433_v51 = vld [vmem:[#allocation5 + $0x180] ss:$16 sps:$4 sm:$0xff]  }
  0x6d   :  { %v3429_v49 = vld [vmem:[#allocation5 + $0x184] ss:$16 sps:$4 sm:$0xff]   ;;  %v3431_v50 = vld [vmem:[#allocation5 + $0x18c] ss:$16 sps:$4 sm:$0xff]   ;;  %2120 = vmatprep.mubr.bf16.mxu0 %v3455_v48  ;;  %2335 = vmatprep.mubr.bf16.mxu1 %v3455_v48  ;;  %v3434_v52 = vld [vmem:[#allocation5 + $0x188] ss:$16 sps:$4 sm:$0xff]  }
  0x6e   :  { %2097 = vmatpush1.bf16.msra.mxu0 %v3385_v18  ;;  %2312 = vmatpush1.bf16.msra.mxu1 %v3386_v19  ;;  %v3435_v53 = vld [vmem:[#allocation5 + $0x1a4] ss:$16 sps:$4 sm:$0xff]   ;;  %v3437_v54 = vld [vmem:[#allocation5 + $0x1ac] ss:$16 sps:$4 sm:$0xff]   ;;  %v3439_v55 = vld [vmem:[#allocation5 + $0x1a0] ss:$16 sps:$4 sm:$0xff]  }
  0x6f   :  { %2098 = vmatprep.subr.bf16.mxu0 %v3387_v20  ;;  %2313 = vmatprep.subr.bf16.mxu1 %v3389_v21  ;;  %v3440_v56 = vld [vmem:[#allocation5 + $0x1a8] ss:$16 sps:$4 sm:$0xff]   ;;  %v3441_v57 = vld [vmem:[#allocation5 + $0x1c4] ss:$16 sps:$4 sm:$0xff]   ;;  %v3443_v58 = vld [vmem:[#allocation5 + $0x1cc] ss:$16 sps:$4 sm:$0xff]  }
  0x70   :  { %v3445_v59 = vld [vmem:[#allocation5 + $0x1c0] ss:$16 sps:$4 sm:$0xff]   ;;  %v3446_v60 = vld [vmem:[#allocation5 + $0x1c8] ss:$16 sps:$4 sm:$0xff]   ;;  %v3447_v61 = vld [vmem:[#allocation5 + $0x1e4] ss:$16 sps:$4 sm:$0xff]  }
  0x71   :  { %v3449_v62 = vld [vmem:[#allocation5 + $0x1ec] ss:$16 sps:$4 sm:$0xff]   ;;  %v3451_v63 = vld [vmem:[#allocation5 + $0x1e0] ss:$16 sps:$4 sm:$0xff]   ;;  %v3452_v0 = vld [vmem:[#allocation5 + $0x1e8] ss:$16 sps:$4 sm:$0xff]  }
  0x72   :  { %2099 = vmatpush1.bf16.msra.mxu0 %v3391_v22  ;;  %2314 = vmatpush1.bf16.msra.mxu1 %v3392_v23  ;;  %v3458_v1 = vld [vmem:[#allocation5 + $0x204] ss:$16 sps:$4 sm:$0xff]   ;;  %v3461_v2 = vld [vmem:[#allocation5 + $0x20c] ss:$16 sps:$4 sm:$0xff]   ;;  %v3453_v3 = vld [vmem:[#allocation2] ss:$40 sps:$4 sm:$0xff]  }
  0x73   :  { %2100 = vmatprep.subr.bf16.mxu0 %v3393_v24  ;;  %2315 = vmatprep.subr.bf16.mxu1 %v3395_v25  ;;  %v3456_v4 = vld [vmem:[#allocation5 + $0x200] ss:$16 sps:$4 sm:$0xff]   ;;  %v3459_v5 = vld [vmem:[#allocation5 + $0x208] ss:$16 sps:$4 sm:$0xff]   ;;  %v3464_v6 = vld [vmem:[#allocation5 + $0x224] ss:$16 sps:$4 sm:$0xff]  }
  0x74   :  { %v3467_v7 = vld [vmem:[#allocation5 + $0x22c] ss:$16 sps:$4 sm:$0xff]   ;;  %v3462_v8 = vld [vmem:[#allocation5 + $0x220] ss:$16 sps:$4 sm:$0xff]   ;;  %v3465_v9 = vld [vmem:[#allocation5 + $0x228] ss:$16 sps:$4 sm:$0xff]  }
  0x75   :  { %v3470_v10 = vld [vmem:[#allocation5 + $0x244] ss:$16 sps:$4 sm:$0xff]   ;;  %v3473_v11 = vld [vmem:[#allocation5 + $0x24c] ss:$16 sps:$4 sm:$0xff]   ;;  %v3468_v12 = vld [vmem:[#allocation5 + $0x240] ss:$16 sps:$4 sm:$0xff]  }
  0x76   :  { %2101 = vmatpush1.bf16.msra.mxu0 %v3397_v26  ;;  %2316 = vmatpush1.bf16.msra.mxu1 %v3398_v27  ;;  %v3471_v13 = vld [vmem:[#allocation5 + $0x248] ss:$16 sps:$4 sm:$0xff]   ;;  %v3476_v14 = vld [vmem:[#allocation5 + $0x264] ss:$16 sps:$4 sm:$0xff]   ;;  %v3479_v15 = vld [vmem:[#allocation5 + $0x26c] ss:$16 sps:$4 sm:$0xff]  }
  0x77   :  { %2102 = vmatprep.subr.bf16.mxu0 %v3399_v28  ;;  %2317 = vmatprep.subr.bf16.mxu1 %v3401_v29  ;;  %v3474_v16 = vld [vmem:[#allocation5 + $0x260] ss:$16 sps:$4 sm:$0xff]   ;;  %v3477_v17 = vld [vmem:[#allocation5 + $0x268] ss:$16 sps:$4 sm:$0xff]   ;;  %v3482_v18 = vld [vmem:[#allocation5 + $0x284] ss:$16 sps:$4 sm:$0xff]  }
  0x78   :  { %v3485_v19 = vld [vmem:[#allocation5 + $0x28c] ss:$16 sps:$4 sm:$0xff]   ;;  %v3480_v20 = vld [vmem:[#allocation5 + $0x280] ss:$16 sps:$4 sm:$0xff]   ;;  %v3483_v21 = vld [vmem:[#allocation5 + $0x288] ss:$16 sps:$4 sm:$0xff]  }
  0x79   :  { %v3488_v22 = vld [vmem:[#allocation5 + $0x2a4] ss:$16 sps:$4 sm:$0xff]   ;;  %v3491_v23 = vld [vmem:[#allocation5 + $0x2ac] ss:$16 sps:$4 sm:$0xff]   ;;  %v3486_v24 = vld [vmem:[#allocation5 + $0x2a0] ss:$16 sps:$4 sm:$0xff]  }
  0x7a   :  { %2103 = vmatpush1.bf16.msra.mxu0 %v3403_v30  ;;  %2318 = vmatpush1.bf16.msra.mxu1 %v3404_v31  ;;  %v3489_v25 = vld [vmem:[#allocation5 + $0x2a8] ss:$16 sps:$4 sm:$0xff]   ;;  %v3494_v26 = vld [vmem:[#allocation5 + $0x2c4] ss:$16 sps:$4 sm:$0xff]   ;;  %v3497_v27 = vld [vmem:[#allocation5 + $0x2cc] ss:$16 sps:$4 sm:$0xff]  }
  0x7b   :  { %2104 = vmatprep.subr.bf16.mxu0 %v3405_v32  ;;  %2319 = vmatprep.subr.bf16.mxu1 %v3407_v33  ;;  %v3492_v28 = vld [vmem:[#allocation5 + $0x2c0] ss:$16 sps:$4 sm:$0xff]   ;;  %v3495_v29 = vld [vmem:[#allocation5 + $0x2c8] ss:$16 sps:$4 sm:$0xff]   ;;  %v3554_v30 = vld [vmem:[#allocation2 + $0xc] ss:$40 sps:$4 sm:$0xff]  }
  0x7c   :  { %v3500_v31 = vld [vmem:[#allocation5 + $0x2e4] ss:$16 sps:$4 sm:$0xff]   ;;  %v3503_v32 = vld [vmem:[#allocation5 + $0x2ec] ss:$16 sps:$4 sm:$0xff]   ;;  %v3498_v33 = vld [vmem:[#allocation5 + $0x2e0] ss:$16 sps:$4 sm:$0xff]  }
  0x7d   :  { %v3527_v48 = vld [vmem:[#allocation5 + $0x36c] ss:$16 sps:$4 sm:$0xff]   ;;  %s4035_s4 = smov [#allocation11]  }
  0x7e   :  { %2105 = vmatpush1.bf16.msra.mxu0 %v3409_v34  ;;  %2320 = vmatpush1.bf16.msra.mxu1 %v3410_v35  ;;  %v3501_v34 = vld [vmem:[#allocation5 + $0x2e8] ss:$16 sps:$4 sm:$0xff]   ;;  %v3506_v35 = vld [vmem:[#allocation5 + $0x304] ss:$16 sps:$4 sm:$0xff]   ;;  %s2882_s3 = sshll.u32 %s4035_s4, 4  ;;  %s2883_s3 = int_to_ptr.vmem [resolvable:$true] %s2882_s3 }
  0x7f   :  { %2106 = vmatprep.subr.bf16.mxu0 %v3411_v36  ;;  %2321 = vmatprep.subr.bf16.mxu1 %v3413_v37  ;;  %v3509_v36 = vld [vmem:[#allocation5 + $0x30c] ss:$16 sps:$4 sm:$0xff]   ;;  %v3504_v37 = vld [vmem:[#allocation5 + $0x300] ss:$16 sps:$4 sm:$0xff]   ;;  %s3994_s30 = scalar_lea.vmem %s2883_s3, 256  ;;  %p3999_p13 = scmp.lt.s32.totalorder %s2883_s3, %s2883_s3 }
  0x80   :  { %p3995_p12 = scmp.ne.s32.totalorder %s2883_s3, %s3994_s30  ;;  %p4000_p0 = scmp.lt.s32.totalorder %s3994_s30, %s3994_s30 }
  0x82   :  { %2107 = vmatpush1.bf16.msra.mxu0 %v3415_v38  ;;  %2322 = vmatpush1.bf16.msra.mxu1 %v3416_v39  ;;  %v3507_v38 = vld [vmem:[#allocation5 + $0x308] ss:$16 sps:$4 sm:$0xff]   ;;  %v3512_v39 = vld [vmem:[#allocation5 + $0x324] ss:$16 sps:$4 sm:$0xff]   ;;  %p4001_p1 = por %p4000_p0, %p3999_p13 }
  0x83   :  { %2108 = vmatprep.subr.bf16.mxu0 %v3417_v40  ;;  %2323 = vmatprep.subr.bf16.mxu1 %v3419_v41  ;;  %v3515_v40 = vld [vmem:[#allocation5 + $0x32c] ss:$16 sps:$4 sm:$0xff]   ;;  %v3510_v41 = vld [vmem:[#allocation5 + $0x320] ss:$16 sps:$4 sm:$0xff]  }
  0x84   :  { %p4002_p2 = pnand %p4001_p1, %p3995_p12 }
  0x86   :  { %2109 = vmatpush1.bf16.msra.mxu0 %v3421_v42  ;;  %2324 = vmatpush1.bf16.msra.mxu1 %v3422_v43  ;;  %v3513_v42 = vld [vmem:[#allocation5 + $0x328] ss:$16 sps:$4 sm:$0xff]   ;;  %v3518_v43 = vld [vmem:[#allocation5 + $0x344] ss:$16 sps:$4 sm:$0xff]  }
  0x87   :  { %2110 = vmatprep.subr.bf16.mxu0 %v3423_v44  ;;  %2325 = vmatprep.subr.bf16.mxu1 %v3425_v45  ;;  %v3521_v44 = vld [vmem:[#allocation5 + $0x34c] ss:$16 sps:$4 sm:$0xff]   ;;  %v3516_v45 = vld [vmem:[#allocation5 + $0x340] ss:$16 sps:$4 sm:$0xff]  }
  0x8a   :  { %2111 = vmatpush1.bf16.msra.mxu0 %v3427_v46  ;;  %2326 = vmatpush1.bf16.msra.mxu1 %v3428_v47  ;;  %v3519_v46 = vld [vmem:[#allocation5 + $0x348] ss:$16 sps:$4 sm:$0xff]   ;;  %v3524_v47 = vld [vmem:[#allocation5 + $0x364] ss:$16 sps:$4 sm:$0xff]  }
  0x8b   :  { %2112 = vmatprep.subr.bf16.mxu0 %v3429_v49  ;;  %2327 = vmatprep.subr.bf16.mxu1 %v3431_v50  ;;  %v3522_v49 = vld [vmem:[#allocation5 + $0x360] ss:$16 sps:$4 sm:$0xff]   ;;  %v3525_v50 = vld [vmem:[#allocation5 + $0x368] ss:$16 sps:$4 sm:$0xff]  }
  0x8e   :  { %2113 = vmatpush1.bf16.msra.mxu0 %v3433_v51  ;;  %2328 = vmatpush1.bf16.msra.mxu1 %v3434_v52  ;;  %v3530_v51 = vld [vmem:[#allocation5 + $0x384] ss:$16 sps:$4 sm:$0xff]   ;;  %v3533_v52 = vld [vmem:[#allocation5 + $0x38c] ss:$16 sps:$4 sm:$0xff]  }
  0x8f   :  { %2114 = vmatprep.subr.bf16.mxu0 %v3435_v53  ;;  %2329 = vmatprep.subr.bf16.mxu1 %v3437_v54  ;;  %v3528_v53 = vld [vmem:[#allocation5 + $0x380] ss:$16 sps:$4 sm:$0xff]   ;;  %v3531_v54 = vld [vmem:[#allocation5 + $0x388] ss:$16 sps:$4 sm:$0xff]  }
  0x92   :  { %2115 = vmatpush1.bf16.msra.mxu0 %v3439_v55  ;;  %2330 = vmatpush1.bf16.msra.mxu1 %v3440_v56  ;;  %v3536_v55 = vld [vmem:[#allocation5 + $0x3a4] ss:$16 sps:$4 sm:$0xff]   ;;  %v3539_v56 = vld [vmem:[#allocation5 + $0x3ac] ss:$16 sps:$4 sm:$0xff]  }
  0x93   :  { %2116 = vmatprep.subr.bf16.mxu0 %v3441_v57  ;;  %2331 = vmatprep.subr.bf16.mxu1 %v3443_v58  ;;  %v3534_v57 = vld [vmem:[#allocation5 + $0x3a0] ss:$16 sps:$4 sm:$0xff]   ;;  %v3537_v58 = vld [vmem:[#allocation5 + $0x3a8] ss:$16 sps:$4 sm:$0xff]  }
  0x96   :  { %2117 = vmatpush1.bf16.msra.mxu0 %v3445_v59  ;;  %2332 = vmatpush1.bf16.msra.mxu1 %v3446_v60  ;;  %v3542_v59 = vld [vmem:[#allocation5 + $0x3c4] ss:$16 sps:$4 sm:$0xff]   ;;  %v3545_v60 = vld [vmem:[#allocation5 + $0x3cc] ss:$16 sps:$4 sm:$0xff]  }
  0x97   :  { %2118 = vmatprep.subr.bf16.mxu0 %v3447_v61  ;;  %2333 = vmatprep.subr.bf16.mxu1 %v3449_v62  ;;  %v3540_v61 = vld [vmem:[#allocation5 + $0x3c0] ss:$16 sps:$4 sm:$0xff]   ;;  %v3543_v62 = vld [vmem:[#allocation5 + $0x3c8] ss:$16 sps:$4 sm:$0xff]  }
  0x9a   :  { %2119 = vmatpush1.bf16.msra.mxu0 %v3451_v63  ;;  %2334 = vmatpush1.bf16.msra.mxu1 %v3452_v0  ;;  %v3548_v63 = vld [vmem:[#allocation5 + $0x3e4] ss:$16 sps:$4 sm:$0xff]   ;;  %v3551_v0 = vld [vmem:[#allocation5 + $0x3ec] ss:$16 sps:$4 sm:$0xff]  }
  0x9b   :  { %2131 = vmatprep.subr.bf16.mxu0 %v3458_v1  ;;  %2346 = vmatprep.subr.bf16.mxu1 %v3461_v2  ;;  %v3546_v1 = vld [vmem:[#allocation5 + $0x3e0] ss:$16 sps:$4 sm:$0xff]   ;;  %v3549_v2 = vld [vmem:[#allocation5 + $0x3e8] ss:$16 sps:$4 sm:$0xff]  }
  0x9d   :  { %2121 = vmatmul.mubr.bf16.vlgmr.msra.gmra.mrb[0].mxu0 %v3453_v3  ;;  %2336 = vmatmul.mubr.bf16.vlgmr.msra.gmra.mrb[0].mxu1 %v3453_v3  ;;  %v3557_v3 = vld [vmem:[#allocation5 + $0x404] ss:$16 sps:$4 sm:$0xff]  }
  0x9e   :  { %2132 = vmatpush1.bf16.msra.mxu0 %v3456_v4  ;;  %2347 = vmatpush1.bf16.msra.mxu1 %v3459_v5  ;;  %v3560_v4 = vld [vmem:[#allocation5 + $0x40c] ss:$16 sps:$4 sm:$0xff]   ;;  %v3552_v5 = vld [vmem:[#allocation2 + $0x8] ss:$40 sps:$4 sm:$0xff]  }
  0x9f   :  { %2133 = vmatprep.subr.bf16.mxu0 %v3464_v6  ;;  %2348 = vmatprep.subr.bf16.mxu1 %v3467_v7  ;;  %v3555_v6 = vld [vmem:[#allocation5 + $0x400] ss:$16 sps:$4 sm:$0xff]   ;;  %v3558_v7 = vld [vmem:[#allocation5 + $0x408] ss:$16 sps:$4 sm:$0xff]  }
  0xa0   :  { %2163 = vmatprep.mubr.bf16.mxu0 %v3554_v30  ;;  %2378 = vmatprep.mubr.bf16.mxu1 %v3554_v30  ;;  %v3596_v30 = vld [vmem:[#allocation5 + $0x4cc] ss:$16 sps:$4 sm:$0xff]  }
  0xa2   :  { %2134 = vmatpush1.bf16.msra.mxu0 %v3462_v8  ;;  %2349 = vmatpush1.bf16.msra.mxu1 %v3465_v9  ;;  %v3563_v8 = vld [vmem:[#allocation5 + $0x424] ss:$16 sps:$4 sm:$0xff]   ;;  %v3566_v9 = vld [vmem:[#allocation5 + $0x42c] ss:$16 sps:$4 sm:$0xff]  }
  0xa3   :  { %2135 = vmatprep.subr.bf16.mxu0 %v3470_v10  ;;  %2350 = vmatprep.subr.bf16.mxu1 %v3473_v11  ;;  %v3561_v10 = vld [vmem:[#allocation5 + $0x420] ss:$16 sps:$4 sm:$0xff]   ;;  %v3564_v11 = vld [vmem:[#allocation5 + $0x428] ss:$16 sps:$4 sm:$0xff]  }
  0xa6   :  { %2136 = vmatpush1.bf16.msra.mxu0 %v3468_v12  ;;  %2351 = vmatpush1.bf16.msra.mxu1 %v3471_v13  ;;  %v3653_v12 = vld [vmem:[#allocation2 + $0x14] ss:$40 sps:$4 sm:$0xff]  }
  0xa7   :  { %2137 = vmatprep.subr.bf16.mxu0 %v3476_v14  ;;  %2352 = vmatprep.subr.bf16.mxu1 %v3479_v15  ;;  %v3569_v13 = vld [vmem:[#allocation5 + $0x444] ss:$16 sps:$4 sm:$0xff]   ;;  %v3572_v14 = vld [vmem:[#allocation5 + $0x44c] ss:$16 sps:$4 sm:$0xff]   ;;  %v3567_v15 = vld [vmem:[#allocation5 + $0x440] ss:$16 sps:$4 sm:$0xff]  }
  0xaa   :  { %2138 = vmatpush1.bf16.msra.mxu0 %v3474_v16  ;;  %2353 = vmatpush1.bf16.msra.mxu1 %v3477_v17  ;;  %v3570_v16 = vld [vmem:[#allocation5 + $0x448] ss:$16 sps:$4 sm:$0xff]   ;;  %v3575_v17 = vld [vmem:[#allocation5 + $0x464] ss:$16 sps:$4 sm:$0xff]  }
  0xab   :  { %2139 = vmatprep.subr.bf16.mxu0 %v3482_v18  ;;  %2354 = vmatprep.subr.bf16.mxu1 %v3485_v19  ;;  %v3578_v18 = vld [vmem:[#allocation5 + $0x46c] ss:$16 sps:$4 sm:$0xff]   ;;  %v3573_v19 = vld [vmem:[#allocation5 + $0x460] ss:$16 sps:$4 sm:$0xff]  }
  0xae   :  { %2140 = vmatpush1.bf16.msra.mxu0 %v3480_v20  ;;  %2355 = vmatpush1.bf16.msra.mxu1 %v3483_v21  ;;  %v3576_v20 = vld [vmem:[#allocation5 + $0x468] ss:$16 sps:$4 sm:$0xff]   ;;  %v3581_v21 = vld [vmem:[#allocation5 + $0x484] ss:$16 sps:$4 sm:$0xff]  }
  0xaf   :  { %2141 = vmatprep.subr.bf16.mxu0 %v3488_v22  ;;  %2356 = vmatprep.subr.bf16.mxu1 %v3491_v23  ;;  %v3584_v22 = vld [vmem:[#allocation5 + $0x48c] ss:$16 sps:$4 sm:$0xff]   ;;  %v3579_v23 = vld [vmem:[#allocation5 + $0x480] ss:$16 sps:$4 sm:$0xff]  }
  0xb2   :  { %2142 = vmatpush1.bf16.msra.mxu0 %v3486_v24  ;;  %2357 = vmatpush1.bf16.msra.mxu1 %v3489_v25  ;;  %v3582_v24 = vld [vmem:[#allocation5 + $0x488] ss:$16 sps:$4 sm:$0xff]   ;;  %v3587_v25 = vld [vmem:[#allocation5 + $0x4a4] ss:$16 sps:$4 sm:$0xff]  }
  0xb3   :  { %2143 = vmatprep.subr.bf16.mxu0 %v3494_v26  ;;  %2358 = vmatprep.subr.bf16.mxu1 %v3497_v27  ;;  %v3590_v26 = vld [vmem:[#allocation5 + $0x4ac] ss:$16 sps:$4 sm:$0xff]   ;;  %v3585_v27 = vld [vmem:[#allocation5 + $0x4a0] ss:$16 sps:$4 sm:$0xff]  }
  0xb6   :  { %2144 = vmatpush1.bf16.msra.mxu0 %v3492_v28  ;;  %2359 = vmatpush1.bf16.msra.mxu1 %v3495_v29  ;;  %v3588_v28 = vld [vmem:[#allocation5 + $0x4a8] ss:$16 sps:$4 sm:$0xff]   ;;  %v3593_v29 = vld [vmem:[#allocation5 + $0x4c4] ss:$16 sps:$4 sm:$0xff]  }
  0xb7   :  { %2145 = vmatprep.subr.bf16.mxu0 %v3500_v31  ;;  %2360 = vmatprep.subr.bf16.mxu1 %v3503_v32  ;;  %v3591_v31 = vld [vmem:[#allocation5 + $0x4c0] ss:$16 sps:$4 sm:$0xff]   ;;  %v3594_v32 = vld [vmem:[#allocation5 + $0x4c8] ss:$16 sps:$4 sm:$0xff]  }
  0xba   :  { %2146 = vmatpush1.bf16.msra.mxu0 %v3498_v33  ;;  %2361 = vmatpush1.bf16.msra.mxu1 %v3501_v34  ;;  %v3599_v33 = vld [vmem:[#allocation5 + $0x4e4] ss:$16 sps:$4 sm:$0xff]   ;;  %v3602_v34 = vld [vmem:[#allocation5 + $0x4ec] ss:$16 sps:$4 sm:$0xff]  }
  0xbb   :  { %2147 = vmatprep.subr.bf16.mxu0 %v3506_v35  ;;  %2362 = vmatprep.subr.bf16.mxu1 %v3509_v36  ;;  %v3597_v35 = vld [vmem:[#allocation5 + $0x4e0] ss:$16 sps:$4 sm:$0xff]   ;;  %v3600_v36 = vld [vmem:[#allocation5 + $0x4e8] ss:$16 sps:$4 sm:$0xff]  }
  0xbe   :  { %2148 = vmatpush1.bf16.msra.mxu0 %v3504_v37  ;;  %2363 = vmatpush1.bf16.msra.mxu1 %v3507_v38  ;;  %v3605_v37 = vld [vmem:[#allocation5 + $0x504] ss:$16 sps:$4 sm:$0xff]   ;;  %v3608_v38 = vld [vmem:[#allocation5 + $0x50c] ss:$16 sps:$4 sm:$0xff]  }
  0xbf   :  { %2149 = vmatprep.subr.bf16.mxu0 %v3512_v39  ;;  %2364 = vmatprep.subr.bf16.mxu1 %v3515_v40  ;;  %v3603_v39 = vld [vmem:[#allocation5 + $0x500] ss:$16 sps:$4 sm:$0xff]   ;;  %v3606_v40 = vld [vmem:[#allocation5 + $0x508] ss:$16 sps:$4 sm:$0xff]  }
  0xc2   :  { %2150 = vmatpush1.bf16.msra.mxu0 %v3510_v41  ;;  %2365 = vmatpush1.bf16.msra.mxu1 %v3513_v42  ;;  %v3611_v41 = vld [vmem:[#allocation5 + $0x524] ss:$16 sps:$4 sm:$0xff]   ;;  %v3614_v42 = vld [vmem:[#allocation5 + $0x52c] ss:$16 sps:$4 sm:$0xff]  }
  0xc3   :  { %2151 = vmatprep.subr.bf16.mxu0 %v3518_v43  ;;  %2366 = vmatprep.subr.bf16.mxu1 %v3521_v44  ;;  %v3609_v43 = vld [vmem:[#allocation5 + $0x520] ss:$16 sps:$4 sm:$0xff]   ;;  %v3612_v44 = vld [vmem:[#allocation5 + $0x528] ss:$16 sps:$4 sm:$0xff]  }
  0xc6   :  { %2152 = vmatpush1.bf16.msra.mxu0 %v3516_v45  ;;  %2367 = vmatpush1.bf16.msra.mxu1 %v3519_v46  ;;  %v3617_v45 = vld [vmem:[#allocation5 + $0x544] ss:$16 sps:$4 sm:$0xff]   ;;  %v3620_v46 = vld [vmem:[#allocation5 + $0x54c] ss:$16 sps:$4 sm:$0xff]  }
  0xc7   :  { %2153 = vmatprep.subr.bf16.mxu0 %v3524_v47  ;;  %2368 = vmatprep.subr.bf16.mxu1 %v3527_v48  ;;  %v3615_v47 = vld [vmem:[#allocation5 + $0x540] ss:$16 sps:$4 sm:$0xff]   ;;  %v3618_v48 = vld [vmem:[#allocation5 + $0x548] ss:$16 sps:$4 sm:$0xff]  }
  0xca   :  { %2154 = vmatpush1.bf16.msra.mxu0 %v3522_v49  ;;  %2369 = vmatpush1.bf16.msra.mxu1 %v3525_v50  ;;  %v3623_v49 = vld [vmem:[#allocation5 + $0x564] ss:$16 sps:$4 sm:$0xff]   ;;  %v3626_v50 = vld [vmem:[#allocation5 + $0x56c] ss:$16 sps:$4 sm:$0xff]  }
  0xcb   :  { %2155 = vmatprep.subr.bf16.mxu0 %v3530_v51  ;;  %2370 = vmatprep.subr.bf16.mxu1 %v3533_v52  ;;  %v3621_v51 = vld [vmem:[#allocation5 + $0x560] ss:$16 sps:$4 sm:$0xff]   ;;  %v3624_v52 = vld [vmem:[#allocation5 + $0x568] ss:$16 sps:$4 sm:$0xff]  }
  0xce   :  { %2156 = vmatpush1.bf16.msra.mxu0 %v3528_v53  ;;  %2371 = vmatpush1.bf16.msra.mxu1 %v3531_v54  ;;  %v3629_v53 = vld [vmem:[#allocation5 + $0x584] ss:$16 sps:$4 sm:$0xff]   ;;  %v3632_v54 = vld [vmem:[#allocation5 + $0x58c] ss:$16 sps:$4 sm:$0xff]  }
  0xcf   :  { %2157 = vmatprep.subr.bf16.mxu0 %v3536_v55  ;;  %2372 = vmatprep.subr.bf16.mxu1 %v3539_v56  ;;  %v3627_v55 = vld [vmem:[#allocation5 + $0x580] ss:$16 sps:$4 sm:$0xff]   ;;  %v3630_v56 = vld [vmem:[#allocation5 + $0x588] ss:$16 sps:$4 sm:$0xff]  }
  0xd2   :  { %2158 = vmatpush1.bf16.msra.mxu0 %v3534_v57  ;;  %2373 = vmatpush1.bf16.msra.mxu1 %v3537_v58  ;;  %v3635_v57 = vld [vmem:[#allocation5 + $0x5a4] ss:$16 sps:$4 sm:$0xff]   ;;  %v3638_v58 = vld [vmem:[#allocation5 + $0x5ac] ss:$16 sps:$4 sm:$0xff]  }
  0xd3   :  { %2159 = vmatprep.subr.bf16.mxu0 %v3542_v59  ;;  %2374 = vmatprep.subr.bf16.mxu1 %v3545_v60  ;;  %v3633_v59 = vld [vmem:[#allocation5 + $0x5a0] ss:$16 sps:$4 sm:$0xff]   ;;  %v3636_v60 = vld [vmem:[#allocation5 + $0x5a8] ss:$16 sps:$4 sm:$0xff]  }
  0xd6   :  { %2160 = vmatpush1.bf16.msra.mxu0 %v3540_v61  ;;  %2375 = vmatpush1.bf16.msra.mxu1 %v3543_v62  ;;  %v3641_v61 = vld [vmem:[#allocation5 + $0x5c4] ss:$16 sps:$4 sm:$0xff]   ;;  %v3644_v62 = vld [vmem:[#allocation5 + $0x5cc] ss:$16 sps:$4 sm:$0xff]  }
  0xd7   :  { %2161 = vmatprep.subr.bf16.mxu0 %v3548_v63  ;;  %2376 = vmatprep.subr.bf16.mxu1 %v3551_v0  ;;  %v3639_v63 = vld [vmem:[#allocation5 + $0x5c0] ss:$16 sps:$4 sm:$0xff]   ;;  %v3642_v0 = vld [vmem:[#allocation5 + $0x5c8] ss:$16 sps:$4 sm:$0xff]  }
  0xda   :  { %2162 = vmatpush1.bf16.msra.mxu0 %v3546_v1  ;;  %2377 = vmatpush1.bf16.msra.mxu1 %v3549_v2  ;;  %v3647_v1 = vld [vmem:[#allocation5 + $0x5e4] ss:$16 sps:$4 sm:$0xff]   ;;  %v3650_v2 = vld [vmem:[#allocation5 + $0x5ec] ss:$16 sps:$4 sm:$0xff]  }
  0xdb   :  { %2174 = vmatprep.subr.bf16.mxu0 %v3557_v3  ;;  %2389 = vmatprep.subr.bf16.mxu1 %v3560_v4  ;;  %v3645_v3 = vld [vmem:[#allocation5 + $0x5e0] ss:$16 sps:$4 sm:$0xff]   ;;  %v3648_v4 = vld [vmem:[#allocation5 + $0x5e8] ss:$16 sps:$4 sm:$0xff]  }
  0xdd   :  { %2164 = vmatmul.mubr.bf16.vlgmr.msra.gmra.mrb[0].mxu0 %v3552_v5  ;;  %2379 = vmatmul.mubr.bf16.vlgmr.msra.gmra.mrb[0].mxu1 %v3552_v5  ;;  %v3656_v5 = vld [vmem:[#allocation5 + $0x604] ss:$16 sps:$4 sm:$0xff]  }
  0xde   :  { %2175 = vmatpush1.bf16.msra.mxu0 %v3555_v6  ;;  %2390 = vmatpush1.bf16.msra.mxu1 %v3558_v7  ;;  %v3659_v6 = vld [vmem:[#allocation5 + $0x60c] ss:$16 sps:$4 sm:$0xff]   ;;  %v3651_v7 = vld [vmem:[#allocation2 + $0x10] ss:$40 sps:$4 sm:$0xff]  }
  0xdf   :  { %2176 = vmatprep.subr.bf16.mxu0 %v3563_v8  ;;  %2391 = vmatprep.subr.bf16.mxu1 %v3566_v9  ;;  %v3654_v8 = vld [vmem:[#allocation5 + $0x600] ss:$16 sps:$4 sm:$0xff]   ;;  %v3657_v9 = vld [vmem:[#allocation5 + $0x608] ss:$16 sps:$4 sm:$0xff]  }
  0xe0   :  { %2206 = vmatprep.mubr.bf16.mxu0 %v3653_v12  ;;  %2421 = vmatprep.mubr.bf16.mxu1 %v3653_v12  ;;  %v3752_v12 = vld [vmem:[#allocation2 + $0x1c] ss:$40 sps:$4 sm:$0xff]  }
  0xe2   :  { %2177 = vmatpush1.bf16.msra.mxu0 %v3561_v10  ;;  %2392 = vmatpush1.bf16.msra.mxu1 %v3564_v11  ;;  %v3662_v10 = vld [vmem:[#allocation5 + $0x624] ss:$16 sps:$4 sm:$0xff]   ;;  %v3665_v11 = vld [vmem:[#allocation5 + $0x62c] ss:$16 sps:$4 sm:$0xff]  }
  0xe3   :  { %2178 = vmatprep.subr.bf16.mxu0 %v3569_v13  ;;  %2393 = vmatprep.subr.bf16.mxu1 %v3572_v14  ;;  %v3660_v13 = vld [vmem:[#allocation5 + $0x620] ss:$16 sps:$4 sm:$0xff]   ;;  %v3663_v14 = vld [vmem:[#allocation5 + $0x628] ss:$16 sps:$4 sm:$0xff]  }
  0xe6   :  { %2179 = vmatpush1.bf16.msra.mxu0 %v3567_v15  ;;  %2394 = vmatpush1.bf16.msra.mxu1 %v3570_v16  ;;  %v3668_v15 = vld [vmem:[#allocation5 + $0x644] ss:$16 sps:$4 sm:$0xff]   ;;  %v3671_v16 = vld [vmem:[#allocation5 + $0x64c] ss:$16 sps:$4 sm:$0xff]  }
  0xe7   :  { %2180 = vmatprep.subr.bf16.mxu0 %v3575_v17  ;;  %2395 = vmatprep.subr.bf16.mxu1 %v3578_v18  ;;  %v3666_v17 = vld [vmem:[#allocation5 + $0x640] ss:$16 sps:$4 sm:$0xff]   ;;  %v3669_v18 = vld [vmem:[#allocation5 + $0x648] ss:$16 sps:$4 sm:$0xff]  }
  0xea   :  { %2181 = vmatpush1.bf16.msra.mxu0 %v3573_v19  ;;  %2396 = vmatpush1.bf16.msra.mxu1 %v3576_v20  ;;  %v3674_v19 = vld [vmem:[#allocation5 + $0x664] ss:$16 sps:$4 sm:$0xff]   ;;  %v3677_v20 = vld [vmem:[#allocation5 + $0x66c] ss:$16 sps:$4 sm:$0xff]  }
  0xeb   :  { %2182 = vmatprep.subr.bf16.mxu0 %v3581_v21  ;;  %2397 = vmatprep.subr.bf16.mxu1 %v3584_v22  ;;  %v3672_v21 = vld [vmem:[#allocation5 + $0x660] ss:$16 sps:$4 sm:$0xff]   ;;  %v3675_v22 = vld [vmem:[#allocation5 + $0x668] ss:$16 sps:$4 sm:$0xff]  }
  0xee   :  { %2183 = vmatpush1.bf16.msra.mxu0 %v3579_v23  ;;  %2398 = vmatpush1.bf16.msra.mxu1 %v3582_v24  ;;  %v3680_v23 = vld [vmem:[#allocation5 + $0x684] ss:$16 sps:$4 sm:$0xff]   ;;  %v3683_v24 = vld [vmem:[#allocation5 + $0x68c] ss:$16 sps:$4 sm:$0xff]  }
  0xef   :  { %2184 = vmatprep.subr.bf16.mxu0 %v3587_v25  ;;  %2399 = vmatprep.subr.bf16.mxu1 %v3590_v26  ;;  %v3678_v25 = vld [vmem:[#allocation5 + $0x680] ss:$16 sps:$4 sm:$0xff]   ;;  %v3681_v26 = vld [vmem:[#allocation5 + $0x688] ss:$16 sps:$4 sm:$0xff]  }
  0xf2   :  { %2185 = vmatpush1.bf16.msra.mxu0 %v3585_v27  ;;  %2400 = vmatpush1.bf16.msra.mxu1 %v3588_v28  ;;  %v3686_v27 = vld [vmem:[#allocation5 + $0x6a4] ss:$16 sps:$4 sm:$0xff]   ;;  %v3689_v28 = vld [vmem:[#allocation5 + $0x6ac] ss:$16 sps:$4 sm:$0xff]  }
  0xf3   :  { %2186 = vmatprep.subr.bf16.mxu0 %v3593_v29  ;;  %2401 = vmatprep.subr.bf16.mxu1 %v3596_v30  ;;  %v3684_v29 = vld [vmem:[#allocation5 + $0x6a0] ss:$16 sps:$4 sm:$0xff]   ;;  %v3687_v30 = vld [vmem:[#allocation5 + $0x6a8] ss:$16 sps:$4 sm:$0xff]  }
  0xf6   :  { %2187 = vmatpush1.bf16.msra.mxu0 %v3591_v31  ;;  %2402 = vmatpush1.bf16.msra.mxu1 %v3594_v32  ;;  %v3692_v31 = vld [vmem:[#allocation5 + $0x6c4] ss:$16 sps:$4 sm:$0xff]   ;;  %v3695_v32 = vld [vmem:[#allocation5 + $0x6cc] ss:$16 sps:$4 sm:$0xff]  }
  0xf7   :  { %2188 = vmatprep.subr.bf16.mxu0 %v3599_v33  ;;  %2403 = vmatprep.subr.bf16.mxu1 %v3602_v34  ;;  %v3690_v33 = vld [vmem:[#allocation5 + $0x6c0] ss:$16 sps:$4 sm:$0xff]   ;;  %v3693_v34 = vld [vmem:[#allocation5 + $0x6c8] ss:$16 sps:$4 sm:$0xff]  }
  0xfa   :  { %2189 = vmatpush1.bf16.msra.mxu0 %v3597_v35  ;;  %2404 = vmatpush1.bf16.msra.mxu1 %v3600_v36  ;;  %v3698_v35 = vld [vmem:[#allocation5 + $0x6e4] ss:$16 sps:$4 sm:$0xff]   ;;  %v3701_v36 = vld [vmem:[#allocation5 + $0x6ec] ss:$16 sps:$4 sm:$0xff]  }
  0xfb   :  { %2190 = vmatprep.subr.bf16.mxu0 %v3605_v37  ;;  %2405 = vmatprep.subr.bf16.mxu1 %v3608_v38  ;;  %v3696_v37 = vld [vmem:[#allocation5 + $0x6e0] ss:$16 sps:$4 sm:$0xff]   ;;  %v3699_v38 = vld [vmem:[#allocation5 + $0x6e8] ss:$16 sps:$4 sm:$0xff]  }
  0xfe   :  { %2191 = vmatpush1.bf16.msra.mxu0 %v3603_v39  ;;  %2406 = vmatpush1.bf16.msra.mxu1 %v3606_v40  ;;  %v3704_v39 = vld [vmem:[#allocation5 + $0x704] ss:$16 sps:$4 sm:$0xff]   ;;  %v3707_v40 = vld [vmem:[#allocation5 + $0x70c] ss:$16 sps:$4 sm:$0xff]  }
  0xff   :  { %2192 = vmatprep.subr.bf16.mxu0 %v3611_v41  ;;  %2407 = vmatprep.subr.bf16.mxu1 %v3614_v42  ;;  %v3702_v41 = vld [vmem:[#allocation5 + $0x700] ss:$16 sps:$4 sm:$0xff]   ;;  %v3705_v42 = vld [vmem:[#allocation5 + $0x708] ss:$16 sps:$4 sm:$0xff]  }
 0x102   :  { %2193 = vmatpush1.bf16.msra.mxu0 %v3609_v43  ;;  %2408 = vmatpush1.bf16.msra.mxu1 %v3612_v44  ;;  %v3710_v43 = vld [vmem:[#allocation5 + $0x724] ss:$16 sps:$4 sm:$0xff]   ;;  %v3713_v44 = vld [vmem:[#allocation5 + $0x72c] ss:$16 sps:$4 sm:$0xff]  }
 0x103   :  { %2194 = vmatprep.subr.bf16.mxu0 %v3617_v45  ;;  %2409 = vmatprep.subr.bf16.mxu1 %v3620_v46  ;;  %v3708_v45 = vld [vmem:[#allocation5 + $0x720] ss:$16 sps:$4 sm:$0xff]   ;;  %v3711_v46 = vld [vmem:[#allocation5 + $0x728] ss:$16 sps:$4 sm:$0xff]  }
 0x106   :  { %2195 = vmatpush1.bf16.msra.mxu0 %v3615_v47  ;;  %2410 = vmatpush1.bf16.msra.mxu1 %v3618_v48  ;;  %v3716_v47 = vld [vmem:[#allocation5 + $0x744] ss:$16 sps:$4 sm:$0xff]   ;;  %v3719_v48 = vld [vmem:[#allocation5 + $0x74c] ss:$16 sps:$4 sm:$0xff]  }
 0x107   :  { %2196 = vmatprep.subr.bf16.mxu0 %v3623_v49  ;;  %2411 = vmatprep.subr.bf16.mxu1 %v3626_v50  ;;  %v3714_v49 = vld [vmem:[#allocation5 + $0x740] ss:$16 sps:$4 sm:$0xff]   ;;  %v3717_v50 = vld [vmem:[#allocation5 + $0x748] ss:$16 sps:$4 sm:$0xff]  }
 0x10a   :  { %2197 = vmatpush1.bf16.msra.mxu0 %v3621_v51  ;;  %2412 = vmatpush1.bf16.msra.mxu1 %v3624_v52  ;;  %v3722_v51 = vld [vmem:[#allocation5 + $0x764] ss:$16 sps:$4 sm:$0xff]   ;;  %v3725_v52 = vld [vmem:[#allocation5 + $0x76c] ss:$16 sps:$4 sm:$0xff]  }
 0x10b   :  { %2198 = vmatprep.subr.bf16.mxu0 %v3629_v53  ;;  %2413 = vmatprep.subr.bf16.mxu1 %v3632_v54  ;;  %v3720_v53 = vld [vmem:[#allocation5 + $0x760] ss:$16 sps:$4 sm:$0xff]   ;;  %v3723_v54 = vld [vmem:[#allocation5 + $0x768] ss:$16 sps:$4 sm:$0xff]  }
 0x10e   :  { %2199 = vmatpush1.bf16.msra.mxu0 %v3627_v55  ;;  %2414 = vmatpush1.bf16.msra.mxu1 %v3630_v56  ;;  %v3728_v55 = vld [vmem:[#allocation5 + $0x784] ss:$16 sps:$4 sm:$0xff]   ;;  %v3731_v56 = vld [vmem:[#allocation5 + $0x78c] ss:$16 sps:$4 sm:$0xff]  }
 0x10f   :  { %2200 = vmatprep.subr.bf16.mxu0 %v3635_v57  ;;  %2415 = vmatprep.subr.bf16.mxu1 %v3638_v58  ;;  %v3726_v57 = vld [vmem:[#allocation5 + $0x780] ss:$16 sps:$4 sm:$0xff]   ;;  %v3729_v58 = vld [vmem:[#allocation5 + $0x788] ss:$16 sps:$4 sm:$0xff]  }
 0x112   :  { %2201 = vmatpush1.bf16.msra.mxu0 %v3633_v59  ;;  %2416 = vmatpush1.bf16.msra.mxu1 %v3636_v60  ;;  %v3734_v59 = vld [vmem:[#allocation5 + $0x7a4] ss:$16 sps:$4 sm:$0xff]   ;;  %v3737_v60 = vld [vmem:[#allocation5 + $0x7ac] ss:$16 sps:$4 sm:$0xff]  }
 0x113   :  { %2202 = vmatprep.subr.bf16.mxu0 %v3641_v61  ;;  %2417 = vmatprep.subr.bf16.mxu1 %v3644_v62  ;;  %v3732_v61 = vld [vmem:[#allocation5 + $0x7a0] ss:$16 sps:$4 sm:$0xff]   ;;  %v3735_v62 = vld [vmem:[#allocation5 + $0x7a8] ss:$16 sps:$4 sm:$0xff]  }
 0x116   :  { %2203 = vmatpush1.bf16.msra.mxu0 %v3639_v63  ;;  %2418 = vmatpush1.bf16.msra.mxu1 %v3642_v0  ;;  %v3740_v63 = vld [vmem:[#allocation5 + $0x7c4] ss:$16 sps:$4 sm:$0xff]   ;;  %v3743_v0 = vld [vmem:[#allocation5 + $0x7cc] ss:$16 sps:$4 sm:$0xff]  }
 0x117   :  { %2204 = vmatprep.subr.bf16.mxu0 %v3647_v1  ;;  %2419 = vmatprep.subr.bf16.mxu1 %v3650_v2  ;;  %v3738_v1 = vld [vmem:[#allocation5 + $0x7c0] ss:$16 sps:$4 sm:$0xff]   ;;  %v3741_v2 = vld [vmem:[#allocation5 + $0x7c8] ss:$16 sps:$4 sm:$0xff]  }
 0x11a   :  { %2205 = vmatpush1.bf16.msra.mxu0 %v3645_v3  ;;  %2420 = vmatpush1.bf16.msra.mxu1 %v3648_v4  ;;  %v3746_v3 = vld [vmem:[#allocation5 + $0x7e4] ss:$16 sps:$4 sm:$0xff]   ;;  %v3749_v4 = vld [vmem:[#allocation5 + $0x7ec] ss:$16 sps:$4 sm:$0xff]  }
 0x11b   :  { %2217 = vmatprep.subr.bf16.mxu0 %v3656_v5  ;;  %2432 = vmatprep.subr.bf16.mxu1 %v3659_v6  ;;  %v3744_v5 = vld [vmem:[#allocation5 + $0x7e0] ss:$16 sps:$4 sm:$0xff]   ;;  %v3747_v6 = vld [vmem:[#allocation5 + $0x7e8] ss:$16 sps:$4 sm:$0xff]  }
 0x11d   :  { %2207 = vmatmul.mubr.bf16.vlgmr.msra.gmra.mrb[0].mxu0 %v3651_v7  ;;  %2422 = vmatmul.mubr.bf16.vlgmr.msra.gmra.mrb[0].mxu1 %v3651_v7  ;;  %v3755_v7 = vld [vmem:[#allocation5 + $0x804] ss:$16 sps:$4 sm:$0xff]  }
 0x11e   :  { %2218 = vmatpush1.bf16.msra.mxu0 %v3654_v8  ;;  %2433 = vmatpush1.bf16.msra.mxu1 %v3657_v9  ;;  %v3758_v8 = vld [vmem:[#allocation5 + $0x80c] ss:$16 sps:$4 sm:$0xff]   ;;  %v3750_v9 = vld [vmem:[#allocation2 + $0x18] ss:$40 sps:$4 sm:$0xff]  }
 0x11f   :  { %2219 = vmatprep.subr.bf16.mxu0 %v3662_v10  ;;  %2434 = vmatprep.subr.bf16.mxu1 %v3665_v11  ;;  %v3753_v10 = vld [vmem:[#allocation5 + $0x800] ss:$16 sps:$4 sm:$0xff]   ;;  %v3756_v11 = vld [vmem:[#allocation5 + $0x808] ss:$16 sps:$4 sm:$0xff]  }
 0x120   :  { %2249 = vmatprep.mubr.bf16.mxu0 %v3752_v12  ;;  %2464 = vmatprep.mubr.bf16.mxu1 %v3752_v12  ;;  %v3761_v12 = vld [vmem:[#allocation5 + $0x824] ss:$16 sps:$4 sm:$0xff]  }
 0x122   :  { %2220 = vmatpush1.bf16.msra.mxu0 %v3660_v13  ;;  %2435 = vmatpush1.bf16.msra.mxu1 %v3663_v14  ;;  %v3764_v13 = vld [vmem:[#allocation5 + $0x82c] ss:$16 sps:$4 sm:$0xff]  }
 0x123   :  { %2221 = vmatprep.subr.bf16.mxu0 %v3668_v15  ;;  %2436 = vmatprep.subr.bf16.mxu1 %v3671_v16  ;;  %v3851_v14 = vld [vmem:[#allocation2 + $0x24] ss:$40 sps:$4 sm:$0xff]   ;;  %v3759_v15 = vld [vmem:[#allocation5 + $0x820] ss:$16 sps:$4 sm:$0xff]   ;;  %v3762_v16 = vld [vmem:[#allocation5 + $0x828] ss:$16 sps:$4 sm:$0xff]  }
 0x126   :  { %2222 = vmatpush1.bf16.msra.mxu0 %v3666_v17  ;;  %2437 = vmatpush1.bf16.msra.mxu1 %v3669_v18  ;;  %v3767_v17 = vld [vmem:[#allocation5 + $0x844] ss:$16 sps:$4 sm:$0xff]   ;;  %v3770_v18 = vld [vmem:[#allocation5 + $0x84c] ss:$16 sps:$4 sm:$0xff]  }
 0x127   :  { %2223 = vmatprep.subr.bf16.mxu0 %v3674_v19  ;;  %2438 = vmatprep.subr.bf16.mxu1 %v3677_v20  ;;  %v3765_v19 = vld [vmem:[#allocation5 + $0x840] ss:$16 sps:$4 sm:$0xff]   ;;  %v3768_v20 = vld [vmem:[#allocation5 + $0x848] ss:$16 sps:$4 sm:$0xff]  }
 0x12a   :  { %2224 = vmatpush1.bf16.msra.mxu0 %v3672_v21  ;;  %2439 = vmatpush1.bf16.msra.mxu1 %v3675_v22  ;;  %v3773_v21 = vld [vmem:[#allocation5 + $0x864] ss:$16 sps:$4 sm:$0xff]   ;;  %v3776_v22 = vld [vmem:[#allocation5 + $0x86c] ss:$16 sps:$4 sm:$0xff]  }
 0x12b   :  { %2225 = vmatprep.subr.bf16.mxu0 %v3680_v23  ;;  %2440 = vmatprep.subr.bf16.mxu1 %v3683_v24  ;;  %v3771_v23 = vld [vmem:[#allocation5 + $0x860] ss:$16 sps:$4 sm:$0xff]   ;;  %v3774_v24 = vld [vmem:[#allocation5 + $0x868] ss:$16 sps:$4 sm:$0xff]  }
 0x12e   :  { %2226 = vmatpush1.bf16.msra.mxu0 %v3678_v25  ;;  %2441 = vmatpush1.bf16.msra.mxu1 %v3681_v26  ;;  %v3779_v25 = vld [vmem:[#allocation5 + $0x884] ss:$16 sps:$4 sm:$0xff]   ;;  %v3782_v26 = vld [vmem:[#allocation5 + $0x88c] ss:$16 sps:$4 sm:$0xff]  }
 0x12f   :  { %2227 = vmatprep.subr.bf16.mxu0 %v3686_v27  ;;  %2442 = vmatprep.subr.bf16.mxu1 %v3689_v28  ;;  %v3777_v27 = vld [vmem:[#allocation5 + $0x880] ss:$16 sps:$4 sm:$0xff]   ;;  %v3780_v28 = vld [vmem:[#allocation5 + $0x888] ss:$16 sps:$4 sm:$0xff]  }
 0x132   :  { %2228 = vmatpush1.bf16.msra.mxu0 %v3684_v29  ;;  %2443 = vmatpush1.bf16.msra.mxu1 %v3687_v30  ;;  %v3785_v29 = vld [vmem:[#allocation5 + $0x8a4] ss:$16 sps:$4 sm:$0xff]   ;;  %v3788_v30 = vld [vmem:[#allocation5 + $0x8ac] ss:$16 sps:$4 sm:$0xff]  }
 0x133   :  { %2229 = vmatprep.subr.bf16.mxu0 %v3692_v31  ;;  %2444 = vmatprep.subr.bf16.mxu1 %v3695_v32  ;;  %v3783_v31 = vld [vmem:[#allocation5 + $0x8a0] ss:$16 sps:$4 sm:$0xff]   ;;  %v3786_v32 = vld [vmem:[#allocation5 + $0x8a8] ss:$16 sps:$4 sm:$0xff]  }
 0x136   :  { %2230 = vmatpush1.bf16.msra.mxu0 %v3690_v33  ;;  %2445 = vmatpush1.bf16.msra.mxu1 %v3693_v34  ;;  %v3791_v33 = vld [vmem:[#allocation5 + $0x8c4] ss:$16 sps:$4 sm:$0xff]   ;;  %v3794_v34 = vld [vmem:[#allocation5 + $0x8cc] ss:$16 sps:$4 sm:$0xff]  }
 0x137   :  { %2231 = vmatprep.subr.bf16.mxu0 %v3698_v35  ;;  %2446 = vmatprep.subr.bf16.mxu1 %v3701_v36  ;;  %v3789_v35 = vld [vmem:[#allocation5 + $0x8c0] ss:$16 sps:$4 sm:$0xff]   ;;  %v3792_v36 = vld [vmem:[#allocation5 + $0x8c8] ss:$16 sps:$4 sm:$0xff]  }
 0x13a   :  { %2232 = vmatpush1.bf16.msra.mxu0 %v3696_v37  ;;  %2447 = vmatpush1.bf16.msra.mxu1 %v3699_v38  ;;  %v3797_v37 = vld [vmem:[#allocation5 + $0x8e4] ss:$16 sps:$4 sm:$0xff]   ;;  %v3800_v38 = vld [vmem:[#allocation5 + $0x8ec] ss:$16 sps:$4 sm:$0xff]  }
 0x13b   :  { %2233 = vmatprep.subr.bf16.mxu0 %v3704_v39  ;;  %2448 = vmatprep.subr.bf16.mxu1 %v3707_v40  ;;  %v3795_v39 = vld [vmem:[#allocation5 + $0x8e0] ss:$16 sps:$4 sm:$0xff]   ;;  %v3798_v40 = vld [vmem:[#allocation5 + $0x8e8] ss:$16 sps:$4 sm:$0xff]  }
 0x13e   :  { %2234 = vmatpush1.bf16.msra.mxu0 %v3702_v41  ;;  %2449 = vmatpush1.bf16.msra.mxu1 %v3705_v42  ;;  %v3803_v41 = vld [vmem:[#allocation5 + $0x904] ss:$16 sps:$4 sm:$0xff]   ;;  %v3806_v42 = vld [vmem:[#allocation5 + $0x90c] ss:$16 sps:$4 sm:$0xff]  }
 0x13f   :  { %2235 = vmatprep.subr.bf16.mxu0 %v3710_v43  ;;  %2450 = vmatprep.subr.bf16.mxu1 %v3713_v44  ;;  %v3801_v43 = vld [vmem:[#allocation5 + $0x900] ss:$16 sps:$4 sm:$0xff]   ;;  %v3804_v44 = vld [vmem:[#allocation5 + $0x908] ss:$16 sps:$4 sm:$0xff]  }
 0x142   :  { %2236 = vmatpush1.bf16.msra.mxu0 %v3708_v45  ;;  %2451 = vmatpush1.bf16.msra.mxu1 %v3711_v46  ;;  %v3809_v45 = vld [vmem:[#allocation5 + $0x924] ss:$16 sps:$4 sm:$0xff]   ;;  %v3812_v46 = vld [vmem:[#allocation5 + $0x92c] ss:$16 sps:$4 sm:$0xff]  }
 0x143   :  { %2237 = vmatprep.subr.bf16.mxu0 %v3716_v47  ;;  %2452 = vmatprep.subr.bf16.mxu1 %v3719_v48  ;;  %v3807_v47 = vld [vmem:[#allocation5 + $0x920] ss:$16 sps:$4 sm:$0xff]   ;;  %v3810_v48 = vld [vmem:[#allocation5 + $0x928] ss:$16 sps:$4 sm:$0xff]  }
 0x146   :  { %2238 = vmatpush1.bf16.msra.mxu0 %v3714_v49  ;;  %2453 = vmatpush1.bf16.msra.mxu1 %v3717_v50  ;;  %v3815_v49 = vld [vmem:[#allocation5 + $0x944] ss:$16 sps:$4 sm:$0xff]   ;;  %v3818_v50 = vld [vmem:[#allocation5 + $0x94c] ss:$16 sps:$4 sm:$0xff]  }
 0x147   :  { %2239 = vmatprep.subr.bf16.mxu0 %v3722_v51  ;;  %2454 = vmatprep.subr.bf16.mxu1 %v3725_v52  ;;  %v3813_v51 = vld [vmem:[#allocation5 + $0x940] ss:$16 sps:$4 sm:$0xff]   ;;  %v3816_v52 = vld [vmem:[#allocation5 + $0x948] ss:$16 sps:$4 sm:$0xff]  }
 0x14a   :  { %2240 = vmatpush1.bf16.msra.mxu0 %v3720_v53  ;;  %2455 = vmatpush1.bf16.msra.mxu1 %v3723_v54  ;;  %v3821_v53 = vld [vmem:[#allocation5 + $0x964] ss:$16 sps:$4 sm:$0xff]   ;;  %v3824_v54 = vld [vmem:[#allocation5 + $0x96c] ss:$16 sps:$4 sm:$0xff]  }
 0x14b   :  { %2241 = vmatprep.subr.bf16.mxu0 %v3728_v55  ;;  %2456 = vmatprep.subr.bf16.mxu1 %v3731_v56  ;;  %v3819_v55 = vld [vmem:[#allocation5 + $0x960] ss:$16 sps:$4 sm:$0xff]   ;;  %v3822_v56 = vld [vmem:[#allocation5 + $0x968] ss:$16 sps:$4 sm:$0xff]  }
 0x14e   :  { %2242 = vmatpush1.bf16.msra.mxu0 %v3726_v57  ;;  %2457 = vmatpush1.bf16.msra.mxu1 %v3729_v58  ;;  %v3827_v57 = vld [vmem:[#allocation5 + $0x984] ss:$16 sps:$4 sm:$0xff]   ;;  %v3830_v58 = vld [vmem:[#allocation5 + $0x98c] ss:$16 sps:$4 sm:$0xff]  }
 0x14f   :  { %2243 = vmatprep.subr.bf16.mxu0 %v3734_v59  ;;  %2458 = vmatprep.subr.bf16.mxu1 %v3737_v60  ;;  %v3825_v59 = vld [vmem:[#allocation5 + $0x980] ss:$16 sps:$4 sm:$0xff]   ;;  %v3828_v60 = vld [vmem:[#allocation5 + $0x988] ss:$16 sps:$4 sm:$0xff]  }
 0x152   :  { %2244 = vmatpush1.bf16.msra.mxu0 %v3732_v61  ;;  %2459 = vmatpush1.bf16.msra.mxu1 %v3735_v62  ;;  %v3833_v61 = vld [vmem:[#allocation5 + $0x9a4] ss:$16 sps:$4 sm:$0xff]   ;;  %v3836_v62 = vld [vmem:[#allocation5 + $0x9ac] ss:$16 sps:$4 sm:$0xff]  }
 0x153   :  { %2245 = vmatprep.subr.bf16.mxu0 %v3740_v63  ;;  %2460 = vmatprep.subr.bf16.mxu1 %v3743_v0  ;;  %v3831_v63 = vld [vmem:[#allocation5 + $0x9a0] ss:$16 sps:$4 sm:$0xff]   ;;  %v3834_v0 = vld [vmem:[#allocation5 + $0x9a8] ss:$16 sps:$4 sm:$0xff]  }
 0x156   :  { %2246 = vmatpush1.bf16.msra.mxu0 %v3738_v1  ;;  %2461 = vmatpush1.bf16.msra.mxu1 %v3741_v2  ;;  %v3839_v1 = vld [vmem:[#allocation5 + $0x9c4] ss:$16 sps:$4 sm:$0xff]   ;;  %v3842_v2 = vld [vmem:[#allocation5 + $0x9cc] ss:$16 sps:$4 sm:$0xff]  }
 0x157   :  { %2247 = vmatprep.subr.bf16.mxu0 %v3746_v3  ;;  %2462 = vmatprep.subr.bf16.mxu1 %v3749_v4  ;;  %v3837_v3 = vld [vmem:[#allocation5 + $0x9c0] ss:$16 sps:$4 sm:$0xff]   ;;  %v3840_v4 = vld [vmem:[#allocation5 + $0x9c8] ss:$16 sps:$4 sm:$0xff]  }
 0x15a   :  { %2248 = vmatpush1.bf16.msra.mxu0 %v3744_v5  ;;  %2463 = vmatpush1.bf16.msra.mxu1 %v3747_v6  ;;  %v3845_v5 = vld [vmem:[#allocation5 + $0x9e4] ss:$16 sps:$4 sm:$0xff]   ;;  %v3848_v6 = vld [vmem:[#allocation5 + $0x9ec] ss:$16 sps:$4 sm:$0xff]  }
 0x15b   :  { %2260 = vmatprep.subr.bf16.mxu0 %v3755_v7  ;;  %2475 = vmatprep.subr.bf16.mxu1 %v3758_v8  ;;  %v3843_v7 = vld [vmem:[#allocation5 + $0x9e0] ss:$16 sps:$4 sm:$0xff]   ;;  %v3846_v8 = vld [vmem:[#allocation5 + $0x9e8] ss:$16 sps:$4 sm:$0xff]  }
 0x15d   :  { %2250 = vmatmul.mubr.bf16.vlgmr.msra.gmra.mrb[0].mxu0 %v3750_v9  ;;  %2465 = vmatmul.mubr.bf16.vlgmr.msra.gmra.mrb[0].mxu1 %v3750_v9  ;;  %v3852_v9 = vld [vmem:[#allocation8 + $0x40] sm:$0xff]  }
 0x15e   :  { %2261 = vmatpush1.bf16.msra.mxu0 %v3753_v10  ;;  %2476 = vmatpush1.bf16.msra.mxu1 %v3756_v11  ;;  %v3853_v10 = vld [vmem:[#allocation8 + $0xc0] sm:$0xff]   ;;  %v3849_v11 = vld [vmem:[#allocation2 + $0x20] ss:$40 sps:$4 sm:$0xff]  }
 0x15f   :  { %2262 = vmatprep.subr.bf16.mxu0 %v3761_v12  ;;  %2477 = vmatprep.subr.bf16.mxu1 %v3764_v13  ;;  %v3854_v12 = vld [vmem:[#allocation8] sm:$0xff]  }
 0x160   :  { %2292 = vmatprep.mubr.bf16.mxu0 %v3851_v14  ;;  %2507 = vmatprep.mubr.bf16.mxu1 %v3851_v14  ;;  %v3855_v13 = vld [vmem:[#allocation8 + $0x80] sm:$0xff]   ;;  %v3856_v14 = vld [vmem:[#allocation8 + $0x48] sm:$0xff]  }
 0x162   :  { %2263 = vmatpush1.bf16.msra.mxu0 %v3759_v15  ;;  %2478 = vmatpush1.bf16.msra.mxu1 %v3762_v16  ;;  %v3857_v15 = vld [vmem:[#allocation8 + $0xc8] sm:$0xff]  }
 0x163   :  { %2264 = vmatprep.subr.bf16.mxu0 %v3767_v17  ;;  %2479 = vmatprep.subr.bf16.mxu1 %v3770_v18  ;;  %v3858_v16 = vld [vmem:[#allocation8 + $0x8] sm:$0xff]   ;;  %v3860_v18 = vld [vmem:[#allocation8 + $0x50] sm:$0xff]  }
 0x164   :  { %v3859_v17 = vld [vmem:[#allocation8 + $0x88] sm:$0xff]  }
 0x166   :  { %2265 = vmatpush1.bf16.msra.mxu0 %v3765_v19  ;;  %2480 = vmatpush1.bf16.msra.mxu1 %v3768_v20  ;;  %v3861_v19 = vld [vmem:[#allocation8 + $0xd0] sm:$0xff]  }
 0x167   :  { %2266 = vmatprep.subr.bf16.mxu0 %v3773_v21  ;;  %2481 = vmatprep.subr.bf16.mxu1 %v3776_v22  ;;  %v3862_v20 = vld [vmem:[#allocation8 + $0x10] sm:$0xff]   ;;  %v3864_v22 = vld [vmem:[#allocation8 + $0x58] sm:$0xff]  }
 0x168   :  { %v3863_v21 = vld [vmem:[#allocation8 + $0x90] sm:$0xff]  }
 0x16a   :  { %2267 = vmatpush1.bf16.msra.mxu0 %v3771_v23  ;;  %2482 = vmatpush1.bf16.msra.mxu1 %v3774_v24  ;;  %v3865_v23 = vld [vmem:[#allocation8 + $0xd8] sm:$0xff]  }
 0x16b   :  { %2268 = vmatprep.subr.bf16.mxu0 %v3779_v25  ;;  %2483 = vmatprep.subr.bf16.mxu1 %v3782_v26  ;;  %v3866_v24 = vld [vmem:[#allocation8 + $0x18] sm:$0xff]   ;;  %v3868_v26 = vld [vmem:[#allocation8 + $0x60] sm:$0xff]  }
 0x16c   :  { %v3867_v25 = vld [vmem:[#allocation8 + $0x98] sm:$0xff]  }
 0x16e   :  { %2269 = vmatpush1.bf16.msra.mxu0 %v3777_v27  ;;  %2484 = vmatpush1.bf16.msra.mxu1 %v3780_v28  ;;  %v3869_v27 = vld [vmem:[#allocation8 + $0xe0] sm:$0xff]  }
 0x16f   :  { %2270 = vmatprep.subr.bf16.mxu0 %v3785_v29  ;;  %2485 = vmatprep.subr.bf16.mxu1 %v3788_v30  ;;  %v3870_v28 = vld [vmem:[#allocation8 + $0x20] sm:$0xff]   ;;  %v3872_v30 = vld [vmem:[#allocation8 + $0x68] sm:$0xff]  }
 0x170   :  { %v3871_v29 = vld [vmem:[#allocation8 + $0xa0] sm:$0xff]  }
 0x172   :  { %2271 = vmatpush1.bf16.msra.mxu0 %v3783_v31  ;;  %2486 = vmatpush1.bf16.msra.mxu1 %v3786_v32  ;;  %v3873_v31 = vld [vmem:[#allocation8 + $0xe8] sm:$0xff]  }
 0x173   :  { %2272 = vmatprep.subr.bf16.mxu0 %v3791_v33  ;;  %2487 = vmatprep.subr.bf16.mxu1 %v3794_v34  ;;  %v3874_v32 = vld [vmem:[#allocation8 + $0x28] sm:$0xff]   ;;  %v3876_v34 = vld [vmem:[#allocation8 + $0x70] sm:$0xff]  }
 0x174   :  { %v3875_v33 = vld [vmem:[#allocation8 + $0xa8] sm:$0xff]  }
 0x176   :  { %2273 = vmatpush1.bf16.msra.mxu0 %v3789_v35  ;;  %2488 = vmatpush1.bf16.msra.mxu1 %v3792_v36  ;;  %v3877_v35 = vld [vmem:[#allocation8 + $0xf0] sm:$0xff]  }
 0x177   :  { %2274 = vmatprep.subr.bf16.mxu0 %v3797_v37  ;;  %2489 = vmatprep.subr.bf16.mxu1 %v3800_v38  ;;  %v3878_v36 = vld [vmem:[#allocation8 + $0x30] sm:$0xff]   ;;  %v3880_v38 = vld [vmem:[#allocation8 + $0x78] sm:$0xff]  }
 0x178   :  { %v3879_v37 = vld [vmem:[#allocation8 + $0xb0] sm:$0xff]  }
 0x17a   :  { %2275 = vmatpush1.bf16.msra.mxu0 %v3795_v39  ;;  %2490 = vmatpush1.bf16.msra.mxu1 %v3798_v40  ;;  %v3881_v39 = vld [vmem:[#allocation8 + $0xf8] sm:$0xff]  }
 0x17b   :  { %2276 = vmatprep.subr.bf16.mxu0 %v3803_v41  ;;  %2491 = vmatprep.subr.bf16.mxu1 %v3806_v42  ;;  %v3882_v40 = vld [vmem:[#allocation8 + $0x38] sm:$0xff]   ;;  %v418_v42 = vlaneseq }
 0x17c   :  { %v3883_v41 = vld [vmem:[#allocation8 + $0xb8] sm:$0xff]  }
 0x17e   :  { %2277 = vmatpush1.bf16.msra.mxu0 %v3801_v43  ;;  %2492 = vmatpush1.bf16.msra.mxu1 %v3804_v44  ;;  %v419_v43 = vshrl.u32 %v418_v42, 7 }
 0x17f   :  { %2278 = vmatprep.subr.bf16.mxu0 %v3809_v45  ;;  %2493 = vmatprep.subr.bf16.mxu1 %v3812_v46  ;;  %v416_v46 = vld [vmem:[#allocation7] sm:$0xf] }
 0x180   :  { %v420_v44 = vsub.s32 0, %v419_v43  ;;  %v428_v45 = vsub.s32 2, %v419_v43 }
 0x182   :  { %2279 = vmatpush1.bf16.msra.mxu0 %v3807_v47  ;;  %2494 = vmatpush1.bf16.msra.mxu1 %v3810_v48  ;;  %v424_v47 = vsub.s32 1, %v419_v43  ;;  %v432_v48 = vsub.s32 3, %v419_v43 }
 0x183   :  { %2280 = vmatprep.subr.bf16.mxu0 %v3815_v49  ;;  %2495 = vmatprep.subr.bf16.mxu1 %v3818_v50  ;;  %v421_v49 = vrot.slane %v416_v46, %v420_v44  ;;  %v429_v50 = vrot.slane %v416_v46, %v428_v45 }
 0x186   :  { %2281 = vmatpush1.bf16.msra.mxu0 %v3813_v51  ;;  %2496 = vmatpush1.bf16.msra.mxu1 %v3816_v52  ;;  %v425_v51 = vrot.slane %v416_v46, %v424_v47  ;;  %v433_v52 = vrot.slane %v416_v46, %v432_v48 }
 0x187   :  { %2282 = vmatprep.subr.bf16.mxu0 %v3821_v53  ;;  %2497 = vmatprep.subr.bf16.mxu1 %v3824_v54 }
 0x18a   :  { %2283 = vmatpush1.bf16.msra.mxu0 %v3819_v55  ;;  %2498 = vmatpush1.bf16.msra.mxu1 %v3822_v56 }
 0x18b   :  { %2284 = vmatprep.subr.bf16.mxu0 %v3827_v57  ;;  %2499 = vmatprep.subr.bf16.mxu1 %v3830_v58 }
 0x18e   :  { %2285 = vmatpush1.bf16.msra.mxu0 %v3825_v59  ;;  %2500 = vmatpush1.bf16.msra.mxu1 %v3828_v60 }
 0x18f   :  { %2286 = vmatprep.subr.bf16.mxu0 %v3833_v61  ;;  %2501 = vmatprep.subr.bf16.mxu1 %v3836_v62 }
 0x192   :  { %2287 = vmatpush1.bf16.msra.mxu0 %v3831_v63  ;;  %2502 = vmatpush1.bf16.msra.mxu1 %v3834_v0 }
 0x193   :  { %2288 = vmatprep.subr.bf16.mxu0 %v3839_v1  ;;  %2503 = vmatprep.subr.bf16.mxu1 %v3842_v2 }
 0x196   :  { %2289 = vmatpush1.bf16.msra.mxu0 %v3837_v3  ;;  %2504 = vmatpush1.bf16.msra.mxu1 %v3840_v4 }
 0x197   :  { %2290 = vmatprep.subr.bf16.mxu0 %v3845_v5  ;;  %2505 = vmatprep.subr.bf16.mxu1 %v3848_v6 }
 0x19a   :  { %2291 = vmatpush1.bf16.msra.mxu0 %v3843_v7  ;;  %2506 = vmatpush1.bf16.msra.mxu1 %v3846_v8 }
 0x19b   :  { %3259 = vmatprep.subr.bf16.mxu0 %v3852_v9  ;;  %3281 = vmatprep.subr.bf16.mxu1 %v3853_v10 }
 0x19d   :  { %2293 = vmatmul.mubr.bf16.vlgmr.msra.gmra.mrb[0].mxu0 %v3849_v11  ;;  %2508 = vmatmul.mubr.bf16.vlgmr.msra.gmra.mrb[0].mxu1 %v3849_v11 }
 0x19e   :  { %3260 = vmatpush3.bf16.msra.mxu0 %v3854_v12  ;;  %3282 = vmatpush3.bf16.msra.mxu1 %v3855_v13 }
 0x19f   :  { %3261 = vmatprep.subr.bf16.mxu0 %v3856_v14  ;;  %3283 = vmatprep.subr.bf16.mxu1 %v3857_v15 }
 0x1a2   :  { %3262 = vmatpush3.bf16.msra.mxu0 %v3858_v16  ;;  %3284 = vmatpush3.bf16.msra.mxu1 %v3859_v17 }
 0x1a3   :  { %3263 = vmatprep.subr.bf16.mxu0 %v3860_v18  ;;  %3285 = vmatprep.subr.bf16.mxu1 %v3861_v19  ;;  %v3226_v19 = vld [vmem:[#allocation10] ss:$0 sm:$0xff] }
 0x1a6   :  { %3264 = vmatpush3.bf16.msra.mxu0 %v3862_v20  ;;  %3286 = vmatpush3.bf16.msra.mxu1 %v3863_v21 }
 0x1a7   :  { %3265 = vmatprep.subr.bf16.mxu0 %v3864_v22  ;;  %3287 = vmatprep.subr.bf16.mxu1 %v3865_v23 }
 0x1aa   :  { %3266 = vmatpush3.bf16.msra.mxu0 %v3866_v24  ;;  %3288 = vmatpush3.bf16.msra.mxu1 %v3867_v25 }
 0x1ab   :  { %3267 = vmatprep.subr.bf16.mxu0 %v3868_v26  ;;  %3289 = vmatprep.subr.bf16.mxu1 %v3869_v27 }
 0x1ae   :  { %3268 = vmatpush3.bf16.msra.mxu0 %v3870_v28  ;;  %3290 = vmatpush3.bf16.msra.mxu1 %v3871_v29 }
 0x1af   :  { %3269 = vmatprep.subr.bf16.mxu0 %v3872_v30  ;;  %3291 = vmatprep.subr.bf16.mxu1 %v3873_v31 }
 0x1b2   :  { %3270 = vmatpush3.bf16.msra.mxu0 %v3874_v32  ;;  %3292 = vmatpush3.bf16.msra.mxu1 %v3875_v33 }
 0x1b3   :  { %3271 = vmatprep.subr.bf16.mxu0 %v3876_v34  ;;  %3293 = vmatprep.subr.bf16.mxu1 %v3877_v35 }
 0x1b6   :  { %3272 = vmatpush3.bf16.msra.mxu0 %v3878_v36  ;;  %3294 = vmatpush3.bf16.msra.mxu1 %v3879_v37 }
 0x1b7   :  { %3273 = vmatprep.subr.bf16.mxu0 %v3880_v38  ;;  %3295 = vmatprep.subr.bf16.mxu1 %v3881_v39 }
 0x1ba   :  { %3274 = vmatpush3.bf16.msra.mxu0 %v3882_v40  ;;  %3296 = vmatpush3.bf16.msra.mxu1 %v3883_v41 }
 0x270   :  { %v2294_v53 = vpop.f32.mrb[0].mxu0  ;;  %v2509_v54 = vpop.f32.mrb[0].mxu1 }
 0x271   :  { %v3303_v55 = vadd.f32 %v2294_v53, %v421_v49  ;;  %v3307_v56 = vadd.f32 %v2509_v54, %v429_v50  ;;  %v2296_v57 = vpop.f32.mrb[1].mxu0  ;;  %v2511_v58 = vpop.f32.mrb[1].mxu1 }
 0x272   :  { %v3304_v59 = vadd.f32 %v2296_v57, %v425_v51  ;;  %v3308_v60 = vadd.f32 %v2511_v58, %v433_v52  ;;  %v2298_v61 = vpop.f32.mrb[2].mxu0  ;;  %v2513_v62 = vpop.f32.mrb[2].mxu1 }
 0x273   :  { %v3305_v63 = vadd.f32 %v2298_v61, %v421_v49  ;;  %v3309_v0 = vadd.f32 %v2513_v62, %v429_v50  ;;  %v2300_v1 = vpop.f32.mrb[3].mxu0  ;;  %v2515_v2 = vpop.f32.mrb[3].mxu1  ;;  %v2518_v5 = vmax.f32 %v3303_v55, 0.0  ;;  %v2520_v6 = vmax.f32 %v3307_v56, 0.0 }
 0x274   :  { %v3306_v3 = vadd.f32 %v2300_v1, %v425_v51  ;;  %v3310_v4 = vadd.f32 %v2515_v2, %v433_v52  ;;  %v2519_v9 = vmax.f32 %v3304_v59, 0.0  ;;  %v2521_v10 = vmax.f32 %v3308_v60, 0.0 }
 0x275   :  { %v2522_v7 = vmax.f32 %v3305_v63, 0.0  ;;  %v2524_v8 = vmax.f32 %v3309_v0, 0.0 }
 0x276   :  { %v2523_v11 = vmax.f32 %v3306_v3, 0.0  ;;  %v2525_v12 = vmax.f32 %v3310_v4, 0.0 }
 0x277   :  { %v2526_v13 = vpack.c.bf16 %v2522_v7, %v2518_v5  ;;  %v2528_v14 = vpack.c.bf16 %v2524_v8, %v2520_v6 }
 0x278   :  { %v2527_v15 = vpack.c.bf16 %v2523_v11, %v2519_v9  ;;  %v2529_v16 = vpack.c.bf16 %v2525_v12, %v2521_v10 }
 0x27a   :  { %2825 = vmatprep.mubr.bf16.mxu0 %v2527_v15  ;;  %2866 = vmatprep.mubr.bf16.mxu1 %v2529_v16 }
 0x27b   :  { %2826 = vmatmul.mubr.bf16.vlgmr.msra.gmra.mrb[4].mxu0 %v2526_v13  ;;  %2867 = vmatmul.mubr.bf16.vlgmr.msra.gmra.mrb[4].mxu1 %v2528_v14 }
 0x34e   :  { %v3275_v17 = vpop.f32.mrb[4].mxu0  ;;  %v3297_v18 = vpop.f32.mrb[4].mxu1 }
 0x34f   :  { %v3276_v20 = vpop.f32.mrb[5].mxu0  ;;  %v3298_v21 = vpop.f32.mrb[5].mxu1 }
 0x350   :  { %v3277_v22 = vadd.f32 %v3276_v20, %v3275_v17  ;;  %v3299_v23 = vadd.f32 %v3298_v21, %v3297_v18  ;;  %v3278_v24 = vpop.f32.mrb[6].mxu0  ;;  %v3300_v25 = vpop.f32.mrb[6].mxu1 }
 0x351   :  { %v3279_v26 = vpop.f32.mrb[7].mxu0  ;;  %v3301_v27 = vpop.f32.mrb[7].mxu1 }
 0x352   :  { %v2828_v28 = vadd.f32 %v3277_v22, %v3226_v19  ;;  %v3280_v29 = vadd.f32 %v3279_v26, %v3278_v24  ;;  %v3302_v30 = vadd.f32 %v3301_v27, %v3300_v25 }
 0x354   :  { %v2869_v31 = vadd.f32 %v3299_v23, %v2828_v28  ;;  %v2831_v32 = vadd.f32 %v3280_v29, %v3226_v19 }
 0x356   :  { %2875 = vst [vmem:[#allocation11] sm:$0xff] %v2869_v31  ;;  %v2872_v33 = vadd.f32 %v3302_v30, %v2831_v32 }
 0x358   :  { %2876 = vst [vmem:[#allocation11 + $0x8] sm:$0xff] %v2872_v33 }
 0x359   :  { %4005 = shalt.err (!%p4002_p2)
}
 0x35a   :  { %s4006_s8 = scalar_lea.hbm %s4145_s5, 256 }
 0x35b   :  { %p4007_p3 = scmp.ne.s32.totalorder %s4145_s5, %s4006_s8  ;;  %p4010_p4 = scmp.lt.u32.totalorder %s4006_s8, %s4145_s5 }
 0x35d   :  { %p4012_p5 = pnand %p4010_p4, %p4007_p3 }
 0x35f   :  { %4015 = shalt.err (!%p4012_p5)
}
 0x360   :  { %s4036_s13 = smov 128   ;;  %s4037_s14 = smov 8  }
 0x361   :  { %2888 = dma.vmem_to_hbm [thread:$0]  %s2883_s3, 256, %s4145_s5, [#allocation4], %s4036_s13, %s4036_s13, %s4037_s14  }
 0x362   :  { %4022 = dma.done.wait [#allocation4], 256  }
 0x363   :  { %4023 = vsyncadd [#allocation4], 4294967040 }
 0x364   :  { %2892 = vsyncpa [#allocation3], 1 }
 0x365   :  { %2893 = vsyncpa [#allocation6], 1 }
 0x366   :  { %2894 = vsyncpa [#allocation9], 1 }
 0x367   :  { %2895 = vsyncpa [#allocation4], 1 }

</bundles_post_ra>
